<compile_context>
chip_gen: v5e
topology: v5e:2x2
jax: 0.10.0
libtpu: 0.0.40
codegen_flags: <defaults>
</compile_context>

<pallas_src>
import jax
import jax.numpy as jnp
from jax.experimental import pallas as pl
from jax.experimental.pallas import tpu as pltpu

# ---- problem sizes (small, structure-preserving) ---------------------------
T = 8        # seq_len
B = 2        # batch (logical)
B_PAD = 8    # batch padded to one full sublane tile
E = 256      # embedding_dim (512*7*7 in the original module)
H = 128      # hidden_dim   (512 in the original module)


def lstm_clf_kernel(x_ref, wih_ref, whh_ref, b_ref, wclf_ref, bclf_ref,
                    out_ref, gx_ref):
    """Whole forward pass in one kernel invocation.

    x_ref:    (T*B_PAD, E)   bf16, time-major, batch-padded, flattened input
    wih_ref:  (E, 4H)        bf16, W_ih^T
    whh_ref:  (H, 4H)        bf16, W_hh^T
    b_ref:    (1, 4H)        f32, b_ih + b_hh
    wclf_ref: (1, H)         f32, classifier weight row
    bclf_ref: (1, 1)         f32 scalar in SMEM, classifier bias
    out_ref:  (B_PAD, 1)     f32 sigmoid probabilities (padded rows garbage)
    gx_ref:   (T*B_PAD, 4H)  bf16 VMEM scratch, hoisted input projection
    """
    # (1) Hoisted input projection: one batched bf16 MXU matmul (f32 accum)
    #     covers every timestep; bias added in f32, stored back as bf16.
    gx_f32 = (jnp.dot(x_ref[...], wih_ref[...],
                      preferred_element_type=jnp.float32) + b_ref[...])
    gx_ref[...] = gx_f32.astype(jnp.bfloat16)

    h = jnp.zeros((B_PAD, H), jnp.float32)
    c = jnp.zeros((B_PAD, H), jnp.float32)

    # (2) T is tiny and static: fully unrolled recurrence. W_hh is re-read from
    #     VMEM each step (not hoisted) to keep vreg pressure near zero; only the
    #     small (B_PAD, H) @ (H, 4H) projection is on the serial critical path.
    for t in range(T):
        gates = (gx_ref[t * B_PAD:(t + 1) * B_PAD, :].astype(jnp.float32)
                 + jnp.dot(h.astype(jnp.bfloat16), whh_ref[...],
                           preferred_element_type=jnp.float32))

        # PyTorch gate order: input, forget, cell(g), output. All f32 math.
        i_g = jax.nn.sigmoid(gates[:, 0 * H:1 * H])
        f_g = jax.nn.sigmoid(gates[:, 1 * H:2 * H])
        g_g = jnp.tanh(gates[:, 2 * H:3 * H])
        o_g = jax.nn.sigmoid(gates[:, 3 * H:4 * H])

        c = f_g * c + i_g * g_g
        h = o_g * jnp.tanh(c)

    # (3) Classifier head on h_T: elementwise multiply + lane reduction on the
    #     VPU/XLU instead of a degenerate (B, H) @ (H, 1) MXU matmul.
    logits = (jnp.sum(h * wclf_ref[...], axis=-1, keepdims=True)
              + bclf_ref[0, 0])
    out_ref[...] = jax.nn.sigmoid(logits)


def seq_model_forward(x, w_ih_t, w_hh_t, b, w_clf, b_clf):
    """x: (T, B, E) f32.  Returns (B, 1) f32 sigmoid probabilities."""
    Tt, Bb, Ee = x.shape

    # Pad batch to a full sublane tile and flatten (T, B_PAD) -> M for the
    # hoisted input projection. Cast the MXU operands to bf16 host-side so the
    # DMA moves half the bytes. Padded rows evolve independently and are
    # discarded after the call.
    x_pad = jnp.pad(x, ((0, 0), (0, B_PAD - Bb), (0, 0)))
    x_flat = x_pad.reshape(Tt * B_PAD, Ee).astype(jnp.bfloat16)
    w_ih_bf = w_ih_t.astype(jnp.bfloat16)
    w_hh_bf = w_hh_t.astype(jnp.bfloat16)

    out_pad = pl.pallas_call(
        lstm_clf_kernel,
        out_shape=jax.ShapeDtypeStruct((B_PAD, 1), jnp.float32),
        grid=(1,),
        in_specs=[
            pl.BlockSpec((Tt * B_PAD, Ee), lambda i: (0, 0)),   # x (bf16)
            pl.BlockSpec((Ee, 4 * H), lambda i: (0, 0)),        # W_ih^T (bf16)
            pl.BlockSpec((H, 4 * H), lambda i: (0, 0)),         # W_hh^T (bf16)
            pl.BlockSpec((1, 4 * H), lambda i: (0, 0)),         # bias (f32)
            pl.BlockSpec((1, H), lambda i: (0, 0)),             # W_clf row (f32)
            pl.BlockSpec(memory_space=pltpu.MemorySpace.SMEM),  # b_clf scalar
        ],
        out_specs=pl.BlockSpec((B_PAD, 1), lambda i: (0, 0)),
        scratch_shapes=[
            pltpu.VMEM((Tt * B_PAD, 4 * H), jnp.bfloat16),      # gates_x
        ],
        compiler_params=pltpu.CompilerParams(
            dimension_semantics=("arbitrary",)),
    )(x_flat, w_ih_bf, w_hh_bf, b, w_clf, b_clf)

    return out_pad[:Bb]


def ref_forward(x, w_ih_t, w_hh_t, b, w_clf, b_clf):
    """Pure-JAX f32 reference (lax.scan LSTM) for correctness check."""
    def step(carry, x_t):
        h, c = carry
        gates = x_t @ w_ih_t + h @ w_hh_t + b
        i_g = jax.nn.sigmoid(gates[:, 0 * H:1 * H])
        f_g = jax.nn.sigmoid(gates[:, 1 * H:2 * H])
        g_g = jnp.tanh(gates[:, 2 * H:3 * H])
        o_g = jax.nn.sigmoid(gates[:, 3 * H:4 * H])
        c = f_g * c + i_g * g_g
        h = o_g * jnp.tanh(c)
        return (h, c), None

    Bb = x.shape[1]
    init = (jnp.zeros((Bb, H), jnp.float32), jnp.zeros((Bb, H), jnp.float32))
    (h, _), _ = jax.lax.scan(step, init, x)
    return jax.nn.sigmoid(h @ w_clf.T + b_clf)


if __name__ == "__main__":
    key = jax.random.PRNGKey(0)
    k_x, k_wih, k_whh, k_bih, k_bhh, k_wc, k_bc = jax.random.split(key, 7)

    # PyTorch-style init: uniform(-1/sqrt(H), 1/sqrt(H)).
    s = 1.0 / jnp.sqrt(H)
    x = jax.random.normal(k_x, (T, B, E), jnp.float32)

    w_ih = jax.random.uniform(k_wih, (4 * H, E), jnp.float32, -s, s)   # (4H, E)
    w_hh = jax.random.uniform(k_whh, (4 * H, H), jnp.float32, -s, s)   # (4H, H)
    b_ih = jax.random.uniform(k_bih, (4 * H,), jnp.float32, -s, s)
    b_hh = jax.random.uniform(k_bhh, (4 * H,), jnp.float32, -s, s)
    w_clf = jax.random.uniform(k_wc, (1, H), jnp.float32, -s, s)       # (1, H)
    b_clf = jax.random.uniform(k_bc, (1,), jnp.float32, -s, s)

    # Kernel-friendly layouts.
    w_ih_t = w_ih.T                          # (E, 4H)
    w_hh_t = w_hh.T                          # (H, 4H)
    b = (b_ih + b_hh).reshape(1, 4 * H)      # (1, 4H)
    b_clf_2d = b_clf.reshape(1, 1)           # (1, 1)

    out = seq_model_forward(x, w_ih_t, w_hh_t, b, w_clf, b_clf_2d)
    out = jax.block_until_ready(out)

    expect = ref_forward(x, w_ih_t, w_hh_t, b, w_clf, b_clf_2d)
    assert out.shape == (B, 1)
    # bf16 matmul operands (f32 accumulation): tolerance relaxed vs f32 ref.
    assert jnp.allclose(out, expect, atol=2e-2, rtol=2e-2), (out, expect)

    print("KERNEL_OK")
</pallas_src>

<mosaic_0001>
module attributes {stable_mosaic.version = 11 : i64} {
  func.func @lstm_clf_kernel(%arg0: i32, %arg1: memref<64x256xbf16, #tpu.memory_space<vmem>>, %arg2: memref<256x512xbf16, #tpu.memory_space<vmem>>, %arg3: memref<128x512xbf16, #tpu.memory_space<vmem>>, %arg4: memref<1x512xf32, #tpu.memory_space<vmem>>, %arg5: memref<1x128xf32, #tpu.memory_space<vmem>>, %arg6: memref<1x1xf32, #tpu.memory_space<smem>>, %arg7: memref<8x1xf32, #tpu.memory_space<vmem>>, %arg8: memref<64x512xbf16, #tpu.memory_space<vmem>>) attributes {dimension_semantics = [#tpu.dimension_semantics<arbitrary>], iteration_bounds = array<i64: 1>, scalar_prefetch = 0 : i64, scratch_operands = 1 : i64, tpu.core_type = #tpu.core_type<tc>, window_params = [{pipeline_mode = #tpu.pipeline_mode<synchronous>, transform_indices = @transform_0, window_bounds = array<i64: 64, 256>}, {pipeline_mode = #tpu.pipeline_mode<synchronous>, transform_indices = @transform_1, window_bounds = array<i64: 256, 512>}, {pipeline_mode = #tpu.pipeline_mode<synchronous>, transform_indices = @transform_2, window_bounds = array<i64: 128, 512>}, {pipeline_mode = #tpu.pipeline_mode<synchronous>, transform_indices = @transform_3, window_bounds = array<i64: 1, 512>}, {pipeline_mode = #tpu.pipeline_mode<synchronous>, transform_indices = @transform_4, window_bounds = array<i64: 1, 128>}, {transform_indices = @transform_5, window_bounds = array<i64: 1, 1>}, {pipeline_mode = #tpu.pipeline_mode<synchronous>, transform_indices = @transform_6, window_bounds = array<i64: 8, 1>}]} {
    %c0 = arith.constant 0 : index
    %c0_0 = arith.constant 0 : index
    %0 = vector.load %arg1[%c0, %c0_0] : memref<64x256xbf16, #tpu.memory_space<vmem>>, vector<64x256xbf16>
    %c0_1 = arith.constant 0 : index
    %c0_2 = arith.constant 0 : index
    %1 = vector.load %arg2[%c0_1, %c0_2] : memref<256x512xbf16, #tpu.memory_space<vmem>>, vector<256x512xbf16>
    %cst = arith.constant dense<0.000000e+00> : vector<64x512xf32>
    %2 = tpu.matmul %0, %1, %cst {dimension_numbers = #tpu.dot_dimension_numbers<[1], [0], [0], [1], [0, 0, 1, 1], [], []>} : vector<64x256xbf16>, vector<256x512xbf16>, vector<64x512xf32> -> vector<64x512xf32>
    %c0_3 = arith.constant 0 : index
    %c0_4 = arith.constant 0 : index
    %3 = vector.load %arg4[%c0_3, %c0_4] : memref<1x512xf32, #tpu.memory_space<vmem>>, vector<1x512xf32>
    %4 = vector.broadcast %3 : vector<1x512xf32> to vector<64x512xf32>
    %5 = arith.addf %2, %4 : vector<64x512xf32>
    %6 = arith.truncf %5 : vector<64x512xf32> to vector<64x512xbf16>
    %c0_5 = arith.constant 0 : index
    %c0_6 = arith.constant 0 : index
    %7 = vector.load %arg8[%c0_5, %c0_6] : memref<64x512xbf16, #tpu.memory_space<vmem>>, vector<64x512xbf16>
    tpu.vector_store %arg8[%c0_5, %c0_6], %6 {strides = array<i32>} : memref<64x512xbf16, #tpu.memory_space<vmem>>, vector<64x512xbf16>,
    %cst_7 = arith.constant 0.000000e+00 : f32
    %8 = vector.broadcast %cst_7 : f32 to vector<8x128xf32>
    %cst_8 = arith.constant 0.000000e+00 : f32
    %9 = vector.broadcast %cst_8 : f32 to vector<8x128xf32>
    %c0_9 = arith.constant 0 : index
    %c0_10 = arith.constant 0 : index
    %10 = vector.load %arg8[%c0_9, %c0_10] : memref<64x512xbf16, #tpu.memory_space<vmem>>, vector<8x512xbf16>
    %11 = arith.extf %10 : vector<8x512xbf16> to vector<8x512xf32>
    %12 = arith.truncf %8 : vector<8x128xf32> to vector<8x128xbf16>
    %c0_11 = arith.constant 0 : index
    %c0_12 = arith.constant 0 : index
    %13 = vector.load %arg3[%c0_11, %c0_12] : memref<128x512xbf16, #tpu.memory_space<vmem>>, vector<128x512xbf16>
    %cst_13 = arith.constant dense<0.000000e+00> : vector<8x512xf32>
    %14 = tpu.matmul %12, %13, %cst_13 {dimension_numbers = #tpu.dot_dimension_numbers<[1], [0], [0], [1], [0, 0, 1, 1], [], []>} : vector<8x128xbf16>, vector<128x512xbf16>, vector<8x512xf32> -> vector<8x512xf32>
    %15 = arith.addf %11, %14 : vector<8x512xf32>
    %16 = vector.extract_strided_slice %15 {offsets = [0, 0], sizes = [8, 128], strides = [1, 1]} : vector<8x512xf32> to vector<8x128xf32>
    %17 = arith.negf %16 : vector<8x128xf32>
    %18 = math.exp %17 : vector<8x128xf32>
    %cst_14 = arith.constant 1.000000e+00 : f32
    %19 = vector.broadcast %cst_14 : f32 to vector<8x128xf32>
    %20 = arith.addf %19, %18 : vector<8x128xf32>
    %21 = arith.divf %19, %20 : vector<8x128xf32>
    %22 = vector.extract_strided_slice %15 {offsets = [0, 128], sizes = [8, 128], strides = [1, 1]} : vector<8x512xf32> to vector<8x128xf32>
    %23 = arith.negf %22 : vector<8x128xf32>
    %24 = math.exp %23 : vector<8x128xf32>
    %cst_15 = arith.constant 1.000000e+00 : f32
    %25 = vector.broadcast %cst_15 : f32 to vector<8x128xf32>
    %26 = arith.addf %25, %24 : vector<8x128xf32>
    %27 = arith.divf %25, %26 : vector<8x128xf32>
    %28 = vector.extract_strided_slice %15 {offsets = [0, 256], sizes = [8, 128], strides = [1, 1]} : vector<8x512xf32> to vector<8x128xf32>
    %29 = math.tanh %28 : vector<8x128xf32>
    %30 = vector.extract_strided_slice %15 {offsets = [0, 384], sizes = [8, 128], strides = [1, 1]} : vector<8x512xf32> to vector<8x128xf32>
    %31 = arith.negf %30 : vector<8x128xf32>
    %32 = math.exp %31 : vector<8x128xf32>
    %cst_16 = arith.constant 1.000000e+00 : f32
    %33 = vector.broadcast %cst_16 : f32 to vector<8x128xf32>
    %34 = arith.addf %33, %32 : vector<8x128xf32>
    %35 = arith.divf %33, %34 : vector<8x128xf32>
    %36 = arith.mulf %27, %9 : vector<8x128xf32>
    %37 = arith.mulf %21, %29 : vector<8x128xf32>
    %38 = arith.addf %36, %37 : vector<8x128xf32>
    %39 = math.tanh %38 : vector<8x128xf32>
    %40 = arith.mulf %35, %39 : vector<8x128xf32>
    %c8 = arith.constant 8 : index
    %c0_17 = arith.constant 0 : index
    %41 = vector.load %arg8[%c8, %c0_17] : memref<64x512xbf16, #tpu.memory_space<vmem>>, vector<8x512xbf16>
    %42 = arith.extf %41 : vector<8x512xbf16> to vector<8x512xf32>
    %43 = arith.truncf %40 : vector<8x128xf32> to vector<8x128xbf16>
    %c0_18 = arith.constant 0 : index
    %c0_19 = arith.constant 0 : index
    %44 = vector.load %arg3[%c0_18, %c0_19] : memref<128x512xbf16, #tpu.memory_space<vmem>>, vector<128x512xbf16>
    %cst_20 = arith.constant dense<0.000000e+00> : vector<8x512xf32>
    %45 = tpu.matmul %43, %44, %cst_20 {dimension_numbers = #tpu.dot_dimension_numbers<[1], [0], [0], [1], [0, 0, 1, 1], [], []>} : vector<8x128xbf16>, vector<128x512xbf16>, vector<8x512xf32> -> vector<8x512xf32>
    %46 = arith.addf %42, %45 : vector<8x512xf32>
    %47 = vector.extract_strided_slice %46 {offsets = [0, 0], sizes = [8, 128], strides = [1, 1]} : vector<8x512xf32> to vector<8x128xf32>
    %48 = arith.negf %47 : vector<8x128xf32>
    %49 = math.exp %48 : vector<8x128xf32>
    %cst_21 = arith.constant 1.000000e+00 : f32
    %50 = vector.broadcast %cst_21 : f32 to vector<8x128xf32>
    %51 = arith.addf %50, %49 : vector<8x128xf32>
    %52 = arith.divf %50, %51 : vector<8x128xf32>
    %53 = vector.extract_strided_slice %46 {offsets = [0, 128], sizes = [8, 128], strides = [1, 1]} : vector<8x512xf32> to vector<8x128xf32>
    %54 = arith.negf %53 : vector<8x128xf32>
    %55 = math.exp %54 : vector<8x128xf32>
    %cst_22 = arith.constant 1.000000e+00 : f32
    %56 = vector.broadcast %cst_22 : f32 to vector<8x128xf32>
    %57 = arith.addf %56, %55 : vector<8x128xf32>
    %58 = arith.divf %56, %57 : vector<8x128xf32>
    %59 = vector.extract_strided_slice %46 {offsets = [0, 256], sizes = [8, 128], strides = [1, 1]} : vector<8x512xf32> to vector<8x128xf32>
    %60 = math.tanh %59 : vector<8x128xf32>
    %61 = vector.extract_strided_slice %46 {offsets = [0, 384], sizes = [8, 128], strides = [1, 1]} : vector<8x512xf32> to vector<8x128xf32>
    %62 = arith.negf %61 : vector<8x128xf32>
    %63 = math.exp %62 : vector<8x128xf32>
    %cst_23 = arith.constant 1.000000e+00 : f32
    %64 = vector.broadcast %cst_23 : f32 to vector<8x128xf32>
    %65 = arith.addf %64, %63 : vector<8x128xf32>
    %66 = arith.divf %64, %65 : vector<8x128xf32>
    %67 = arith.mulf %58, %38 : vector<8x128xf32>
    %68 = arith.mulf %52, %60 : vector<8x128xf32>
    %69 = arith.addf %67, %68 : vector<8x128xf32>
    %70 = math.tanh %69 : vector<8x128xf32>
    %71 = arith.mulf %66, %70 : vector<8x128xf32>
    %c16 = arith.constant 16 : index
    %c0_24 = arith.constant 0 : index
    %72 = vector.load %arg8[%c16, %c0_24] : memref<64x512xbf16, #tpu.memory_space<vmem>>, vector<8x512xbf16>
    %73 = arith.extf %72 : vector<8x512xbf16> to vector<8x512xf32>
    %74 = arith.truncf %71 : vector<8x128xf32> to vector<8x128xbf16>
    %c0_25 = arith.constant 0 : index
    %c0_26 = arith.constant 0 : index
    %75 = vector.load %arg3[%c0_25, %c0_26] : memref<128x512xbf16, #tpu.memory_space<vmem>>, vector<128x512xbf16>
    %cst_27 = arith.constant dense<0.000000e+00> : vector<8x512xf32>
    %76 = tpu.matmul %74, %75, %cst_27 {dimension_numbers = #tpu.dot_dimension_numbers<[1], [0], [0], [1], [0, 0, 1, 1], [], []>} : vector<8x128xbf16>, vector<128x512xbf16>, vector<8x512xf32> -> vector<8x512xf32>
    %77 = arith.addf %73, %76 : vector<8x512xf32>
    %78 = vector.extract_strided_slice %77 {offsets = [0, 0], sizes = [8, 128], strides = [1, 1]} : vector<8x512xf32> to vector<8x128xf32>
    %79 = arith.negf %78 : vector<8x128xf32>
    %80 = math.exp %79 : vector<8x128xf32>
    %cst_28 = arith.constant 1.000000e+00 : f32
    %81 = vector.broadcast %cst_28 : f32 to vector<8x128xf32>
    %82 = arith.addf %81, %80 : vector<8x128xf32>
    %83 = arith.divf %81, %82 : vector<8x128xf32>
    %84 = vector.extract_strided_slice %77 {offsets = [0, 128], sizes = [8, 128], strides = [1, 1]} : vector<8x512xf32> to vector<8x128xf32>
    %85 = arith.negf %84 : vector<8x128xf32>
    %86 = math.exp %85 : vector<8x128xf32>
    %cst_29 = arith.constant 1.000000e+00 : f32
    %87 = vector.broadcast %cst_29 : f32 to vector<8x128xf32>
    %88 = arith.addf %87, %86 : vector<8x128xf32>
    %89 = arith.divf %87, %88 : vector<8x128xf32>
    %90 = vector.extract_strided_slice %77 {offsets = [0, 256], sizes = [8, 128], strides = [1, 1]} : vector<8x512xf32> to vector<8x128xf32>
    %91 = math.tanh %90 : vector<8x128xf32>
    %92 = vector.extract_strided_slice %77 {offsets = [0, 384], sizes = [8, 128], strides = [1, 1]} : vector<8x512xf32> to vector<8x128xf32>
    %93 = arith.negf %92 : vector<8x128xf32>
    %94 = math.exp %93 : vector<8x128xf32>
    %cst_30 = arith.constant 1.000000e+00 : f32
    %95 = vector.broadcast %cst_30 : f32 to vector<8x128xf32>
    %96 = arith.addf %95, %94 : vector<8x128xf32>
    %97 = arith.divf %95, %96 : vector<8x128xf32>
    %98 = arith.mulf %89, %69 : vector<8x128xf32>
    %99 = arith.mulf %83, %91 : vector<8x128xf32>
    %100 = arith.addf %98, %99 : vector<8x128xf32>
    %101 = math.tanh %100 : vector<8x128xf32>
    %102 = arith.mulf %97, %101 : vector<8x128xf32>
    %c24 = arith.constant 24 : index
    %c0_31 = arith.constant 0 : index
    %103 = vector.load %arg8[%c24, %c0_31] : memref<64x512xbf16, #tpu.memory_space<vmem>>, vector<8x512xbf16>
    %104 = arith.extf %103 : vector<8x512xbf16> to vector<8x512xf32>
    %105 = arith.truncf %102 : vector<8x128xf32> to vector<8x128xbf16>
    %c0_32 = arith.constant 0 : index
    %c0_33 = arith.constant 0 : index
    %106 = vector.load %arg3[%c0_32, %c0_33] : memref<128x512xbf16, #tpu.memory_space<vmem>>, vector<128x512xbf16>
    %cst_34 = arith.constant dense<0.000000e+00> : vector<8x512xf32>
    %107 = tpu.matmul %105, %106, %cst_34 {dimension_numbers = #tpu.dot_dimension_numbers<[1], [0], [0], [1], [0, 0, 1, 1], [], []>} : vector<8x128xbf16>, vector<128x512xbf16>, vector<8x512xf32> -> vector<8x512xf32>
    %108 = arith.addf %104, %107 : vector<8x512xf32>
    %109 = vector.extract_strided_slice %108 {offsets = [0, 0], sizes = [8, 128], strides = [1, 1]} : vector<8x512xf32> to vector<8x128xf32>
    %110 = arith.negf %109 : vector<8x128xf32>
    %111 = math.exp %110 : vector<8x128xf32>
    %cst_35 = arith.constant 1.000000e+00 : f32
    %112 = vector.broadcast %cst_35 : f32 to vector<8x128xf32>
    %113 = arith.addf %112, %111 : vector<8x128xf32>
    %114 = arith.divf %112, %113 : vector<8x128xf32>
    %115 = vector.extract_strided_slice %108 {offsets = [0, 128], sizes = [8, 128], strides = [1, 1]} : vector<8x512xf32> to vector<8x128xf32>
    %116 = arith.negf %115 : vector<8x128xf32>
    %117 = math.exp %116 : vector<8x128xf32>
    %cst_36 = arith.constant 1.000000e+00 : f32
    %118 = vector.broadcast %cst_36 : f32 to vector<8x128xf32>
    %119 = arith.addf %118, %117 : vector<8x128xf32>
    %120 = arith.divf %118, %119 : vector<8x128xf32>
    %121 = vector.extract_strided_slice %108 {offsets = [0, 256], sizes = [8, 128], strides = [1, 1]} : vector<8x512xf32> to vector<8x128xf32>
    %122 = math.tanh %121 : vector<8x128xf32>
    %123 = vector.extract_strided_slice %108 {offsets = [0, 384], sizes = [8, 128], strides = [1, 1]} : vector<8x512xf32> to vector<8x128xf32>
    %124 = arith.negf %123 : vector<8x128xf32>
    %125 = math.exp %124 : vector<8x128xf32>
    %cst_37 = arith.constant 1.000000e+00 : f32
    %126 = vector.broadcast %cst_37 : f32 to vector<8x128xf32>
    %127 = arith.addf %126, %125 : vector<8x128xf32>
    %128 = arith.divf %126, %127 : vector<8x128xf32>
    %129 = arith.mulf %120, %100 : vector<8x128xf32>
    %130 = arith.mulf %114, %122 : vector<8x128xf32>
    %131 = arith.addf %129, %130 : vector<8x128xf32>
    %132 = math.tanh %131 : vector<8x128xf32>
    %133 = arith.mulf %128, %132 : vector<8x128xf32>
    %c32 = arith.constant 32 : index
    %c0_38 = arith.constant 0 : index
    %134 = vector.load %arg8[%c32, %c0_38] : memref<64x512xbf16, #tpu.memory_space<vmem>>, vector<8x512xbf16>
    %135 = arith.extf %134 : vector<8x512xbf16> to vector<8x512xf32>
    %136 = arith.truncf %133 : vector<8x128xf32> to vector<8x128xbf16>
    %c0_39 = arith.constant 0 : index
    %c0_40 = arith.constant 0 : index
    %137 = vector.load %arg3[%c0_39, %c0_40] : memref<128x512xbf16, #tpu.memory_space<vmem>>, vector<128x512xbf16>
    %cst_41 = arith.constant dense<0.000000e+00> : vector<8x512xf32>
    %138 = tpu.matmul %136, %137, %cst_41 {dimension_numbers = #tpu.dot_dimension_numbers<[1], [0], [0], [1], [0, 0, 1, 1], [], []>} : vector<8x128xbf16>, vector<128x512xbf16>, vector<8x512xf32> -> vector<8x512xf32>
    %139 = arith.addf %135, %138 : vector<8x512xf32>
    %140 = vector.extract_strided_slice %139 {offsets = [0, 0], sizes = [8, 128], strides = [1, 1]} : vector<8x512xf32> to vector<8x128xf32>
    %141 = arith.negf %140 : vector<8x128xf32>
    %142 = math.exp %141 : vector<8x128xf32>
    %cst_42 = arith.constant 1.000000e+00 : f32
    %143 = vector.broadcast %cst_42 : f32 to vector<8x128xf32>
    %144 = arith.addf %143, %142 : vector<8x128xf32>
    %145 = arith.divf %143, %144 : vector<8x128xf32>
    %146 = vector.extract_strided_slice %139 {offsets = [0, 128], sizes = [8, 128], strides = [1, 1]} : vector<8x512xf32> to vector<8x128xf32>
    %147 = arith.negf %146 : vector<8x128xf32>
    %148 = math.exp %147 : vector<8x128xf32>
    %cst_43 = arith.constant 1.000000e+00 : f32
    %149 = vector.broadcast %cst_43 : f32 to vector<8x128xf32>
    %150 = arith.addf %149, %148 : vector<8x128xf32>
    %151 = arith.divf %149, %150 : vector<8x128xf32>
    %152 = vector.extract_strided_slice %139 {offsets = [0, 256], sizes = [8, 128], strides = [1, 1]} : vector<8x512xf32> to vector<8x128xf32>
    %153 = math.tanh %152 : vector<8x128xf32>
    %154 = vector.extract_strided_slice %139 {offsets = [0, 384], sizes = [8, 128], strides = [1, 1]} : vector<8x512xf32> to vector<8x128xf32>
    %155 = arith.negf %154 : vector<8x128xf32>
    %156 = math.exp %155 : vector<8x128xf32>
    %cst_44 = arith.constant 1.000000e+00 : f32
    %157 = vector.broadcast %cst_44 : f32 to vector<8x128xf32>
    %158 = arith.addf %157, %156 : vector<8x128xf32>
    %159 = arith.divf %157, %158 : vector<8x128xf32>
    %160 = arith.mulf %151, %131 : vector<8x128xf32>
    %161 = arith.mulf %145, %153 : vector<8x128xf32>
    %162 = arith.addf %160, %161 : vector<8x128xf32>
    %163 = math.tanh %162 : vector<8x128xf32>
    %164 = arith.mulf %159, %163 : vector<8x128xf32>
    %c40 = arith.constant 40 : index
    %c0_45 = arith.constant 0 : index
    %165 = vector.load %arg8[%c40, %c0_45] : memref<64x512xbf16, #tpu.memory_space<vmem>>, vector<8x512xbf16>
    %166 = arith.extf %165 : vector<8x512xbf16> to vector<8x512xf32>
    %167 = arith.truncf %164 : vector<8x128xf32> to vector<8x128xbf16>
    %c0_46 = arith.constant 0 : index
    %c0_47 = arith.constant 0 : index
    %168 = vector.load %arg3[%c0_46, %c0_47] : memref<128x512xbf16, #tpu.memory_space<vmem>>, vector<128x512xbf16>
    %cst_48 = arith.constant dense<0.000000e+00> : vector<8x512xf32>
    %169 = tpu.matmul %167, %168, %cst_48 {dimension_numbers = #tpu.dot_dimension_numbers<[1], [0], [0], [1], [0, 0, 1, 1], [], []>} : vector<8x128xbf16>, vector<128x512xbf16>, vector<8x512xf32> -> vector<8x512xf32>
    %170 = arith.addf %166, %169 : vector<8x512xf32>
    %171 = vector.extract_strided_slice %170 {offsets = [0, 0], sizes = [8, 128], strides = [1, 1]} : vector<8x512xf32> to vector<8x128xf32>
    %172 = arith.negf %171 : vector<8x128xf32>
    %173 = math.exp %172 : vector<8x128xf32>
    %cst_49 = arith.constant 1.000000e+00 : f32
    %174 = vector.broadcast %cst_49 : f32 to vector<8x128xf32>
    %175 = arith.addf %174, %173 : vector<8x128xf32>
    %176 = arith.divf %174, %175 : vector<8x128xf32>
    %177 = vector.extract_strided_slice %170 {offsets = [0, 128], sizes = [8, 128], strides = [1, 1]} : vector<8x512xf32> to vector<8x128xf32>
    %178 = arith.negf %177 : vector<8x128xf32>
    %179 = math.exp %178 : vector<8x128xf32>
    %cst_50 = arith.constant 1.000000e+00 : f32
    %180 = vector.broadcast %cst_50 : f32 to vector<8x128xf32>
    %181 = arith.addf %180, %179 : vector<8x128xf32>
    %182 = arith.divf %180, %181 : vector<8x128xf32>
    %183 = vector.extract_strided_slice %170 {offsets = [0, 256], sizes = [8, 128], strides = [1, 1]} : vector<8x512xf32> to vector<8x128xf32>
    %184 = math.tanh %183 : vector<8x128xf32>
    %185 = vector.extract_strided_slice %170 {offsets = [0, 384], sizes = [8, 128], strides = [1, 1]} : vector<8x512xf32> to vector<8x128xf32>
    %186 = arith.negf %185 : vector<8x128xf32>
    %187 = math.exp %186 : vector<8x128xf32>
    %cst_51 = arith.constant 1.000000e+00 : f32
    %188 = vector.broadcast %cst_51 : f32 to vector<8x128xf32>
    %189 = arith.addf %188, %187 : vector<8x128xf32>
    %190 = arith.divf %188, %189 : vector<8x128xf32>
    %191 = arith.mulf %182, %162 : vector<8x128xf32>
    %192 = arith.mulf %176, %184 : vector<8x128xf32>
    %193 = arith.addf %191, %192 : vector<8x128xf32>
    %194 = math.tanh %193 : vector<8x128xf32>
    %195 = arith.mulf %190, %194 : vector<8x128xf32>
    %c48 = arith.constant 48 : index
    %c0_52 = arith.constant 0 : index
    %196 = vector.load %arg8[%c48, %c0_52] : memref<64x512xbf16, #tpu.memory_space<vmem>>, vector<8x512xbf16>
    %197 = arith.extf %196 : vector<8x512xbf16> to vector<8x512xf32>
    %198 = arith.truncf %195 : vector<8x128xf32> to vector<8x128xbf16>
    %c0_53 = arith.constant 0 : index
    %c0_54 = arith.constant 0 : index
    %199 = vector.load %arg3[%c0_53, %c0_54] : memref<128x512xbf16, #tpu.memory_space<vmem>>, vector<128x512xbf16>
    %cst_55 = arith.constant dense<0.000000e+00> : vector<8x512xf32>
    %200 = tpu.matmul %198, %199, %cst_55 {dimension_numbers = #tpu.dot_dimension_numbers<[1], [0], [0], [1], [0, 0, 1, 1], [], []>} : vector<8x128xbf16>, vector<128x512xbf16>, vector<8x512xf32> -> vector<8x512xf32>
    %201 = arith.addf %197, %200 : vector<8x512xf32>
    %202 = vector.extract_strided_slice %201 {offsets = [0, 0], sizes = [8, 128], strides = [1, 1]} : vector<8x512xf32> to vector<8x128xf32>
    %203 = arith.negf %202 : vector<8x128xf32>
    %204 = math.exp %203 : vector<8x128xf32>
    %cst_56 = arith.constant 1.000000e+00 : f32
    %205 = vector.broadcast %cst_56 : f32 to vector<8x128xf32>
    %206 = arith.addf %205, %204 : vector<8x128xf32>
    %207 = arith.divf %205, %206 : vector<8x128xf32>
    %208 = vector.extract_strided_slice %201 {offsets = [0, 128], sizes = [8, 128], strides = [1, 1]} : vector<8x512xf32> to vector<8x128xf32>
    %209 = arith.negf %208 : vector<8x128xf32>
    %210 = math.exp %209 : vector<8x128xf32>
    %cst_57 = arith.constant 1.000000e+00 : f32
    %211 = vector.broadcast %cst_57 : f32 to vector<8x128xf32>
    %212 = arith.addf %211, %210 : vector<8x128xf32>
    %213 = arith.divf %211, %212 : vector<8x128xf32>
    %214 = vector.extract_strided_slice %201 {offsets = [0, 256], sizes = [8, 128], strides = [1, 1]} : vector<8x512xf32> to vector<8x128xf32>
    %215 = math.tanh %214 : vector<8x128xf32>
    %216 = vector.extract_strided_slice %201 {offsets = [0, 384], sizes = [8, 128], strides = [1, 1]} : vector<8x512xf32> to vector<8x128xf32>
    %217 = arith.negf %216 : vector<8x128xf32>
    %218 = math.exp %217 : vector<8x128xf32>
    %cst_58 = arith.constant 1.000000e+00 : f32
    %219 = vector.broadcast %cst_58 : f32 to vector<8x128xf32>
    %220 = arith.addf %219, %218 : vector<8x128xf32>
    %221 = arith.divf %219, %220 : vector<8x128xf32>
    %222 = arith.mulf %213, %193 : vector<8x128xf32>
    %223 = arith.mulf %207, %215 : vector<8x128xf32>
    %224 = arith.addf %222, %223 : vector<8x128xf32>
    %225 = math.tanh %224 : vector<8x128xf32>
    %226 = arith.mulf %221, %225 : vector<8x128xf32>
    %c56 = arith.constant 56 : index
    %c0_59 = arith.constant 0 : index
    %227 = vector.load %arg8[%c56, %c0_59] : memref<64x512xbf16, #tpu.memory_space<vmem>>, vector<8x512xbf16>
    %228 = arith.extf %227 : vector<8x512xbf16> to vector<8x512xf32>
    %229 = arith.truncf %226 : vector<8x128xf32> to vector<8x128xbf16>
    %c0_60 = arith.constant 0 : index
    %c0_61 = arith.constant 0 : index
    %230 = vector.load %arg3[%c0_60, %c0_61] : memref<128x512xbf16, #tpu.memory_space<vmem>>, vector<128x512xbf16>
    %cst_62 = arith.constant dense<0.000000e+00> : vector<8x512xf32>
    %231 = tpu.matmul %229, %230, %cst_62 {dimension_numbers = #tpu.dot_dimension_numbers<[1], [0], [0], [1], [0, 0, 1, 1], [], []>} : vector<8x128xbf16>, vector<128x512xbf16>, vector<8x512xf32> -> vector<8x512xf32>
    %232 = arith.addf %228, %231 : vector<8x512xf32>
    %233 = vector.extract_strided_slice %232 {offsets = [0, 0], sizes = [8, 128], strides = [1, 1]} : vector<8x512xf32> to vector<8x128xf32>
    %234 = arith.negf %233 : vector<8x128xf32>
    %235 = math.exp %234 : vector<8x128xf32>
    %cst_63 = arith.constant 1.000000e+00 : f32
    %236 = vector.broadcast %cst_63 : f32 to vector<8x128xf32>
    %237 = arith.addf %236, %235 : vector<8x128xf32>
    %238 = arith.divf %236, %237 : vector<8x128xf32>
    %239 = vector.extract_strided_slice %232 {offsets = [0, 128], sizes = [8, 128], strides = [1, 1]} : vector<8x512xf32> to vector<8x128xf32>
    %240 = arith.negf %239 : vector<8x128xf32>
    %241 = math.exp %240 : vector<8x128xf32>
    %cst_64 = arith.constant 1.000000e+00 : f32
    %242 = vector.broadcast %cst_64 : f32 to vector<8x128xf32>
    %243 = arith.addf %242, %241 : vector<8x128xf32>
    %244 = arith.divf %242, %243 : vector<8x128xf32>
    %245 = vector.extract_strided_slice %232 {offsets = [0, 256], sizes = [8, 128], strides = [1, 1]} : vector<8x512xf32> to vector<8x128xf32>
    %246 = math.tanh %245 : vector<8x128xf32>
    %247 = vector.extract_strided_slice %232 {offsets = [0, 384], sizes = [8, 128], strides = [1, 1]} : vector<8x512xf32> to vector<8x128xf32>
    %248 = arith.negf %247 : vector<8x128xf32>
    %249 = math.exp %248 : vector<8x128xf32>
    %cst_65 = arith.constant 1.000000e+00 : f32
    %250 = vector.broadcast %cst_65 : f32 to vector<8x128xf32>
    %251 = arith.addf %250, %249 : vector<8x128xf32>
    %252 = arith.divf %250, %251 : vector<8x128xf32>
    %253 = arith.mulf %244, %224 : vector<8x128xf32>
    %254 = arith.mulf %238, %246 : vector<8x128xf32>
    %255 = arith.addf %253, %254 : vector<8x128xf32>
    %256 = math.tanh %255 : vector<8x128xf32>
    %257 = arith.mulf %252, %256 : vector<8x128xf32>
    %c0_66 = arith.constant 0 : index
    %c0_67 = arith.constant 0 : index
    %258 = vector.load %arg5[%c0_66, %c0_67] : memref<1x128xf32, #tpu.memory_space<vmem>>, vector<1x128xf32>
    %259 = vector.broadcast %258 : vector<1x128xf32> to vector<8x128xf32>
    %260 = arith.mulf %257, %259 : vector<8x128xf32>
    %cst_68 = arith.constant dense<0.000000e+00> : vector<8xf32>
    %261 = vector.multi_reduction <add>, %260, %cst_68 [1] : vector<8x128xf32> to vector<8xf32>
    %262 = vector.shape_cast %261 : vector<8xf32> to vector<8x1xf32>
    %c0_69 = arith.constant 0 : index
    %c0_70 = arith.constant 0 : index
    %263 = memref.load %arg6[%c0_69, %c0_70] : memref<1x1xf32, #tpu.memory_space<smem>>
    %264 = vector.broadcast %263 : f32 to vector<8x1xf32>
    %265 = arith.addf %262, %264 : vector<8x1xf32>
    %266 = arith.negf %265 : vector<8x1xf32>
    %267 = math.exp %266 : vector<8x1xf32>
    %cst_71 = arith.constant 1.000000e+00 : f32
    %268 = vector.broadcast %cst_71 : f32 to vector<8x1xf32>
    %269 = arith.addf %268, %267 : vector<8x1xf32>
    %270 = arith.divf %268, %269 : vector<8x1xf32>
    %c0_72 = arith.constant 0 : index
    %c0_73 = arith.constant 0 : index
    %271 = vector.load %arg7[%c0_72, %c0_73] : memref<8x1xf32, #tpu.memory_space<vmem>>, vector<8x1xf32>
    tpu.vector_store %arg7[%c0_72, %c0_73], %270 {strides = array<i32>} : memref<8x1xf32, #tpu.memory_space<vmem>>, vector<8x1xf32>,
    return
  }
  func.func @transform_0(%arg0: i32) -> (i32, i32) {
    %c0_i32 = arith.constant 0 : i32
    %c0_i32_0 = arith.constant 0 : i32
    %c0_i32_1 = arith.constant 0 : i32
    return %c0_i32, %c0_i32_0 : i32, i32
  }
  func.func @transform_1(%arg0: i32) -> (i32, i32) {
    %c0_i32 = arith.constant 0 : i32
    %c0_i32_0 = arith.constant 0 : i32
    %c0_i32_1 = arith.constant 0 : i32
    return %c0_i32, %c0_i32_0 : i32, i32
  }
  func.func @transform_2(%arg0: i32) -> (i32, i32) {
    %c0_i32 = arith.constant 0 : i32
    %c0_i32_0 = arith.constant 0 : i32
    %c0_i32_1 = arith.constant 0 : i32
    return %c0_i32, %c0_i32_0 : i32, i32
  }
  func.func @transform_3(%arg0: i32) -> (i32, i32) {
    %c0_i32 = arith.constant 0 : i32
    %c0_i32_0 = arith.constant 0 : i32
    %c0_i32_1 = arith.constant 0 : i32
    return %c0_i32, %c0_i32_0 : i32, i32
  }
  func.func @transform_4(%arg0: i32) -> (i32, i32) {
    %c0_i32 = arith.constant 0 : i32
    %c0_i32_0 = arith.constant 0 : i32
    %c0_i32_1 = arith.constant 0 : i32
    return %c0_i32, %c0_i32_0 : i32, i32
  }
  func.func @transform_5(%arg0: i32) -> (i32, i32) {
    %c0_i32 = arith.constant 0 : i32
    %c0_i32_0 = arith.constant 0 : i32
    %c0_i32_1 = arith.constant 0 : i32
    return %c0_i32, %c0_i32_0 : i32, i32
  }
  func.func @transform_6(%arg0: i32) -> (i32, i32) {
    %c0_i32 = arith.constant 0 : i32
    %c0_i32_0 = arith.constant 0 : i32
    %c0_i32_1 = arith.constant 0 : i32
    return %c0_i32, %c0_i32_0 : i32, i32
  }
}

</mosaic_0001>

<bundles_post_ra>
// kernel: tpu_custom_call.1
= control target key start
LH: loop header
LB: loop body
LE: loop exit
PB: predicated region body
PF: predicated region fallthrough
CT: control target
= control target key end

     0   :  { %12 = vsyncpa [#allocation5], 0  ;;  %s3335_s0 = inlined_call_operand.hbm [shape: bf16[64,256], index: 0, kind: input, shape index: {}]   ;;  %s3336_s1 = inlined_call_operand.hbm [shape: bf16[256,512], index: 1, kind: input, shape index: {}]   ;;  %s3337_s2 = inlined_call_operand.hbm [shape: bf16[128,512], index: 2, kind: input, shape index: {}]   ;;  %s3338_s3 = inlined_call_operand.vmem [shape: f32[1,512], index: 3, kind: input, shape index: {}]   ;;  %s3339_s4 = inlined_call_operand.vmem [shape: f32[1,128], index: 4, kind: input, shape index: {}]   ;;  %s3340_s5 = inlined_call_operand.<no memory space> [shape: f32[1,1], index: 5, kind: input, shape index: {}]   ;;  %s3341_s6 = inlined_call_operand.vmem [shape: f32[8,1], index: 6, kind: output, shape index: {}]  }
   0x1   :  { %13 = vsyncpa [#allocation7], 0  ;;  %s31_s23 = sshll.u32 %s3336_s1, 4  ;;  %s2776_s24 = smov [#allocation6]   ;;  %s32_s23 = int_to_ptr.hbm [resolvable:$true] %s31_s23 }
   0x2   :  { %s33_s25 = sshll.u32 %s2776_s24, 4  ;;  %s18_s28 = sshll.u32 %s3335_s0, 4  ;;  %s34_s25 = int_to_ptr.vmem [resolvable:$true] %s33_s25  ;;  %s19_s28 = int_to_ptr.hbm [resolvable:$true] %s18_s28 }
   0x3   :  { %s2777_s29 = smov 256   ;;  %s2778_s30 = smov 16  }
   0x4   :  { %39 = dma.hbm_to_vmem [thread:$0]  %s32_s23, 8192, %s34_s25, [#allocation7], %s2777_s29, %s2777_s29, %s2778_s30  }
   0x5   :  { %s2779_s7 = smov [#allocation4]   ;;  %s2780_s9 = smov 128  }
   0x6   :  { %s20_s8 = sshll.u32 %s2779_s7, 4  ;;  %s2781_s10 = smov 8   ;;  %s21_s8 = int_to_ptr.vmem [resolvable:$true] %s20_s8 }
   0x7   :  { %26 = dma.hbm_to_vmem [thread:$0]  %s19_s28, 1024, %s21_s8, [#allocation5], %s2780_s9, %s2780_s9, %s2781_s10  }
   0x8   :  { %s44_s12 = sshll.u32 %s3337_s2, 4  ;;  %s2782_s13 = smov [#allocation8]   ;;  %s45_s12 = int_to_ptr.hbm [resolvable:$true] %s44_s12 }
   0x9   :  { %s46_s14 = sshll.u32 %s2782_s13, 4  ;;  %s47_s14 = int_to_ptr.vmem [resolvable:$true] %s46_s14 }
   0xa   :  { %52 = dma.hbm_to_vmem [thread:$0]  %s45_s12, 4096, %s47_s14, [#allocation7], %s2777_s29, %s2777_s29, %s2778_s30  }
   0xb   :  { %2772 = dma.done.wait [#allocation5], 1024  }
   0xc   :  { %2773 = vsyncadd [#allocation5], 4294966272 }
   0xd   :  { %2774 = dma.done.wait [#allocation7], 12288  }
   0xe   :  { %2775 = vsyncadd [#allocation7], 4294955008  ;;  %v2160_v0 = vld [vmem:[#allocation6 + $0xe0] sm:$0xf]  ;;  %v2493_v1 = vld [vmem:[#allocation6 + $0xec] sm:$0xf0] }
   0xf   :  { %v2288_v2 = vld [vmem:[#allocation6 + $0x1e0] sm:$0xf]  ;;  %v2161_v3 = vor.u32 %v2493_v1, %v2160_v0  ;;  %v2525_v4 = vld [vmem:[#allocation6 + $0x1ec] sm:$0xf0]  ;;  %v2491_v5 = vld [vmem:[#allocation6 + $0xe4] sm:$0xf] }
  0x10   :  { %v2162_v6 = vld [vmem:[#allocation6 + $0xf0] sm:$0xf0]  ;;  %v2289_v7 = vor.u32 %v2525_v4, %v2288_v2  ;;  %v2523_v9 = vld [vmem:[#allocation6 + $0x1e4] sm:$0xf]  ;;  %v2144_v11 = vld [vmem:[#allocation6 + $0xc0] sm:$0xf] }
  0x11   :  { %v2165_v8 = vor.u32 %v2491_v5, %v2162_v6  ;;  %v2290_v10 = vld [vmem:[#allocation6 + $0x1f0] sm:$0xf0]  ;;  %514 = vmatpush.bf16.msra.mxu0 %v2161_v3  ;;  %v2489_v13 = vld [vmem:[#allocation6 + $0xcc] sm:$0xf0]  ;;  %v2272_v14 = vld [vmem:[#allocation6 + $0x1c0] sm:$0xf] }
  0x12   :  { %v2293_v12 = vor.u32 %v2523_v9, %v2290_v10  ;;  %v2521_v15 = vld [vmem:[#allocation6 + $0x1cc] sm:$0xf0]  ;;  %543 = vmatpush.bf16.msra.mxu1 %v2289_v7  ;;  %v2145_v16 = vor.u32 %v2489_v13, %v2144_v11  ;;  %v2487_v18 = vld [vmem:[#allocation6 + $0xc4] sm:$0xf]  ;;  %v2146_v19 = vld [vmem:[#allocation6 + $0xd0] sm:$0xf0] }
  0x13   :  { %572 = vmatpush.bf16.msra.mxu2 %v2165_v8  ;;  %v2273_v17 = vor.u32 %v2521_v15, %v2272_v14  ;;  %v2519_v20 = vld [vmem:[#allocation6 + $0x1c4] sm:$0xf]  ;;  %v2149_v21 = vor.u32 %v2487_v18, %v2146_v19  ;;  %v2274_v22 = vld [vmem:[#allocation6 + $0x1d0] sm:$0xf0]  ;;  %v2128_v23 = vld [vmem:[#allocation6 + $0xa0] sm:$0xf] }
  0x14   :  { %601 = vmatpush.bf16.msra.mxu3 %v2293_v12  ;;  %v2485_v24 = vld [vmem:[#allocation6 + $0xac] sm:$0xf0]  ;;  %v2277_v25 = vor.u32 %v2519_v20, %v2274_v22  ;;  %v2256_v26 = vld [vmem:[#allocation6 + $0x1a0] sm:$0xf]  ;;  %v2483_v28 = vld [vmem:[#allocation6 + $0xa4] sm:$0xf] }
  0x15   :  { %v2517_v27 = vld [vmem:[#allocation6 + $0x1ac] sm:$0xf0]  ;;  %515 = vmatpush.bf16.msra.mxu0 %v2145_v16  ;;  %v2129_v29 = vor.u32 %v2485_v24, %v2128_v23  ;;  %v2130_v30 = vld [vmem:[#allocation6 + $0xb0] sm:$0xf0]  ;;  %v2515_v31 = vld [vmem:[#allocation6 + $0x1a4] sm:$0xf] }
  0x16   :  { %v2258_v32 = vld [vmem:[#allocation6 + $0x1b0] sm:$0xf0]  ;;  %544 = vmatpush.bf16.msra.mxu1 %v2273_v17  ;;  %v2257_v33 = vor.u32 %v2517_v27, %v2256_v26  ;;  %v2133_v34 = vor.u32 %v2483_v28, %v2130_v30  ;;  %v2112_v35 = vld [vmem:[#allocation6 + $0x80] sm:$0xf]  ;;  %v2481_v36 = vld [vmem:[#allocation6 + $0x8c] sm:$0xf0] }
  0x17   :  { %573 = vmatpush.bf16.msra.mxu2 %v2149_v21  ;;  %v2240_v37 = vld [vmem:[#allocation6 + $0x180] sm:$0xf]  ;;  %v2261_v38 = vor.u32 %v2515_v31, %v2258_v32  ;;  %v2513_v39 = vld [vmem:[#allocation6 + $0x18c] sm:$0xf0]  ;;  %v2479_v40 = vld [vmem:[#allocation6 + $0x84] sm:$0xf]  ;;  %v2113_v44 = vor.u32 %v2481_v36, %v2112_v35 }
  0x18   :  { %602 = vmatpush.bf16.msra.mxu3 %v2277_v25  ;;  %v2114_v41 = vld [vmem:[#allocation6 + $0x90] sm:$0xf0]  ;;  %v2511_v42 = vld [vmem:[#allocation6 + $0x184] sm:$0xf]  ;;  %v2241_v45 = vor.u32 %v2513_v39, %v2240_v37  ;;  %v2096_v47 = vld [vmem:[#allocation6 + $0x60] sm:$0xf] }
  0x19   :  { %v2242_v43 = vld [vmem:[#allocation6 + $0x190] sm:$0xf0]  ;;  %516 = vmatpush.bf16.msra.mxu0 %v2129_v29  ;;  %v2117_v46 = vor.u32 %v2479_v40, %v2114_v41  ;;  %v2477_v48 = vld [vmem:[#allocation6 + $0x6c] sm:$0xf0]  ;;  %v2224_v49 = vld [vmem:[#allocation6 + $0x160] sm:$0xf] }
  0x1a   :  { %545 = vmatpush.bf16.msra.mxu1 %v2257_v33  ;;  %v2245_v50 = vor.u32 %v2511_v42, %v2242_v43  ;;  %v2509_v51 = vld [vmem:[#allocation6 + $0x16c] sm:$0xf0]  ;;  %v2475_v52 = vld [vmem:[#allocation6 + $0x64] sm:$0xf]  ;;  %v2098_v53 = vld [vmem:[#allocation6 + $0x70] sm:$0xf0]  ;;  %v2097_v56 = vor.u32 %v2477_v48, %v2096_v47 }
  0x1b   :  { %574 = vmatpush.bf16.msra.mxu2 %v2133_v34  ;;  %v2507_v54 = vld [vmem:[#allocation6 + $0x164] sm:$0xf]  ;;  %v2226_v55 = vld [vmem:[#allocation6 + $0x170] sm:$0xf0]  ;;  %v2225_v57 = vor.u32 %v2509_v51, %v2224_v49  ;;  %v2101_v58 = vor.u32 %v2475_v52, %v2098_v53  ;;  %v2080_v59 = vld [vmem:[#allocation6 + $0x40] sm:$0xf] }
  0x1c   :  { %603 = vmatpush.bf16.msra.mxu3 %v2261_v38  ;;  %v2473_v60 = vld [vmem:[#allocation6 + $0x4c] sm:$0xf0]  ;;  %v2208_v61 = vld [vmem:[#allocation6 + $0x140] sm:$0xf]  ;;  %v2229_v62 = vor.u32 %v2507_v54, %v2226_v55  ;;  %v2471_v0 = vld [vmem:[#allocation6 + $0x44] sm:$0xf] }
  0x1d   :  { %517 = vmatpush.bf16.msra.mxu0 %v2113_v44  ;;  %v2505_v63 = vld [vmem:[#allocation6 + $0x14c] sm:$0xf0]  ;;  %v2082_v1 = vld [vmem:[#allocation6 + $0x50] sm:$0xf0]  ;;  %v2503_v2 = vld [vmem:[#allocation6 + $0x144] sm:$0xf]  ;;  %v2081_v4 = vor.u32 %v2473_v60, %v2080_v59 }
  0x1e   :  { %546 = vmatpush.bf16.msra.mxu1 %v2241_v45  ;;  %v2210_v3 = vld [vmem:[#allocation6 + $0x150] sm:$0xf0]  ;;  %v2209_v5 = vor.u32 %v2505_v63, %v2208_v61  ;;  %v2085_v6 = vor.u32 %v2471_v0, %v2082_v1  ;;  %v2064_v7 = vld [vmem:[#allocation6 + $0x20] sm:$0xf]  ;;  %v2469_v8 = vld [vmem:[#allocation6 + $0x2c] sm:$0xf0] }
  0x1f   :  { %575 = vmatpush.bf16.msra.mxu2 %v2117_v46  ;;  %v2192_v9 = vld [vmem:[#allocation6 + $0x120] sm:$0xf]  ;;  %v2213_v10 = vor.u32 %v2503_v2, %v2210_v3  ;;  %v2501_v11 = vld [vmem:[#allocation6 + $0x12c] sm:$0xf0]  ;;  %v2467_v12 = vld [vmem:[#allocation6 + $0x24] sm:$0xf]  ;;  %v2065_v16 = vor.u32 %v2469_v8, %v2064_v7 }
  0x20   :  { %604 = vmatpush.bf16.msra.mxu3 %v2245_v50  ;;  %v2066_v13 = vld [vmem:[#allocation6 + $0x30] sm:$0xf0]  ;;  %v2499_v14 = vld [vmem:[#allocation6 + $0x124] sm:$0xf]  ;;  %v2048_v17 = vld [vmem:[#allocation6] sm:$0xf]  ;;  %v2193_v19 = vor.u32 %v2501_v11, %v2192_v9 }
  0x21   :  { %518 = vmatpush.bf16.msra.mxu0 %v2097_v56  ;;  %v2194_v15 = vld [vmem:[#allocation6 + $0x130] sm:$0xf0]  ;;  %v2465_v18 = vld [vmem:[#allocation6 + $0xc] sm:$0xf0]  ;;  %v2069_v20 = vor.u32 %v2467_v12, %v2066_v13  ;;  %v2176_v21 = vld [vmem:[#allocation6 + $0x100] sm:$0xf] }
  0x22   :  { %547 = vmatpush.bf16.msra.mxu1 %v2225_v57  ;;  %v2497_v22 = vld [vmem:[#allocation6 + $0x10c] sm:$0xf0]  ;;  %v2463_v23 = vld [vmem:[#allocation6 + $0x4] sm:$0xf]  ;;  %v2197_v24 = vor.u32 %v2499_v14, %v2194_v15  ;;  %v2050_v25 = vld [vmem:[#allocation6 + $0x10] sm:$0xf0]  ;;  %v2049_v31 = vor.u32 %v2465_v18, %v2048_v17 }
  0x23   :  { %576 = vmatpush.bf16.msra.mxu2 %v2101_v58  ;;  %v2495_v26 = vld [vmem:[#allocation6 + $0x104] sm:$0xf]  ;;  %v2178_v27 = vld [vmem:[#allocation6 + $0x110] sm:$0xf0]  ;;  %v2016_v28 = vld [vmem:[#allocation4] sm:$0xf]  ;;  %v2177_v35 = vor.u32 %v2497_v22, %v2176_v21  ;;  %v2053_v36 = vor.u32 %v2463_v23, %v2050_v25 }
  0x24   :  { %605 = vmatpush.bf16.msra.mxu3 %v2229_v62  ;;  %v2168_v29 = vld [vmem:[#allocation6 + $0xe8] sm:$0xf]  ;;  %v2494_v30 = vld [vmem:[#allocation6 + $0xf4] sm:$0xf0]  ;;  %v2455_v37 = vld [vmem:[#allocation4 + $0x4] sm:$0xf]  ;;  %v2181_v39 = vor.u32 %v2495_v26, %v2178_v27 }
  0x25   :  { %519 = vmatpush.bf16.msra.mxu0 %v2081_v4  ;;  %v2456_v32 = vld [vmem:[#allocation4 + $0x4] sm:$0xf0]  ;;  %v2526_v34 = vld [vmem:[#allocation6 + $0x1f4] sm:$0xf0]  ;;  %v2018_v38 = vld [vmem:[#allocation4 + $0x8] sm:$0xf0]  ;;  %v2169_v40 = vor.u32 %v2494_v30, %v2168_v29 }
  0x26   :  { %548 = vmatpush.bf16.msra.mxu1 %v2209_v5  ;;  %v2296_v33 = vld [vmem:[#allocation6 + $0x1e8] sm:$0xf]  ;;  %v2524_v41 = vld [vmem:[#allocation6 + $0x1ec] sm:$0xf]  ;;  %v2170_v43 = vld [vmem:[#allocation6 + $0xf8] sm:$0xf0]  ;;  %v2828_v44 = vor.u32 %v2456_v32, %v2016_v28  ;;  %v2830_v49 = vor.u32 %v2455_v37, %v2018_v38 }
  0x27   :  { %577 = vmatpush.bf16.msra.mxu2 %v2085_v6  ;;  %v2492_v42 = vld [vmem:[#allocation6 + $0xec] sm:$0xf]  ;;  %v2297_v45 = vor.u32 %v2526_v34, %v2296_v33  ;;  %v2298_v46 = vld [vmem:[#allocation6 + $0x1f8] sm:$0xf0]  ;;  %v2152_v47 = vld [vmem:[#allocation6 + $0xc8] sm:$0xf] }
  0x28   :  { %606 = vmatpush.bf16.msra.mxu3 %v2213_v10  ;;  %v2490_v48 = vld [vmem:[#allocation6 + $0xd4] sm:$0xf0]  ;;  %v2280_v50 = vld [vmem:[#allocation6 + $0x1c8] sm:$0xf]  ;;  %v2173_v52 = vor.u32 %v2492_v42, %v2170_v43  ;;  %v2301_v53 = vor.u32 %v2524_v41, %v2298_v46  ;;  %v2520_v55 = vld [vmem:[#allocation6 + $0x1cc] sm:$0xf] }
  0x29   :  { %520 = vmatpush.bf16.msra.mxu0 %v2065_v16  ;;  %v2522_v51 = vld [vmem:[#allocation6 + $0x1d4] sm:$0xf0]  ;;  %v2153_v54 = vor.u32 %v2490_v48, %v2152_v47  ;;  %v2488_v56 = vld [vmem:[#allocation6 + $0xcc] sm:$0xf]  ;;  %v2154_v57 = vld [vmem:[#allocation6 + $0xd8] sm:$0xf0] }
  0x2a   :  { %549 = vmatpush.bf16.msra.mxu1 %v2193_v19  ;;  %v2281_v58 = vor.u32 %v2522_v51, %v2280_v50  ;;  %v2282_v59 = vld [vmem:[#allocation6 + $0x1d8] sm:$0xf0]  ;;  %v2136_v60 = vld [vmem:[#allocation6 + $0xa8] sm:$0xf]  ;;  %v2486_v61 = vld [vmem:[#allocation6 + $0xb4] sm:$0xf0]  ;;  %v2157_v0 = vor.u32 %v2488_v56, %v2154_v57 }
  0x2b   :  { %578 = vmatpush.bf16.msra.mxu2 %v2069_v20  ;;  %v2264_v62 = vld [vmem:[#allocation6 + $0x1a8] sm:$0xf]  ;;  %v2518_v63 = vld [vmem:[#allocation6 + $0x1b4] sm:$0xf0]  ;;  %v2285_v1 = vor.u32 %v2520_v55, %v2282_v59  ;;  %v2137_v2 = vor.u32 %v2486_v61, %v2136_v60  ;;  %v2516_v3 = vld [vmem:[#allocation6 + $0x1ac] sm:$0xf] }
  0x2c   :  { %607 = vmatpush.bf16.msra.mxu3 %v2197_v24  ;;  %v2484_v4 = vld [vmem:[#allocation6 + $0xac] sm:$0xf]  ;;  %v2138_v5 = vld [vmem:[#allocation6 + $0xb8] sm:$0xf0]  ;;  %v2265_v6 = vor.u32 %v2518_v63, %v2264_v62  ;;  %v2120_v8 = vld [vmem:[#allocation6 + $0x88] sm:$0xf] }
  0x2d   :  { %521 = vmatpush.bf16.msra.mxu0 %v2049_v31  ;;  %v2266_v7 = vld [vmem:[#allocation6 + $0x1b8] sm:$0xf0]  ;;  %v2482_v9 = vld [vmem:[#allocation6 + $0x94] sm:$0xf0]  ;;  %v2248_v10 = vld [vmem:[#allocation6 + $0x188] sm:$0xf]  ;;  %v2141_v12 = vor.u32 %v2484_v4, %v2138_v5 }
  0x2e   :  { %550 = vmatpush.bf16.msra.mxu1 %v2177_v35  ;;  %v2514_v11 = vld [vmem:[#allocation6 + $0x194] sm:$0xf0]  ;;  %v2024_v13 = vld [vmem:[#allocation4 + $0x10] sm:$0xf]  ;;  %v2269_v14 = vor.u32 %v2516_v3, %v2266_v7  ;;  %v2121_v15 = vor.u32 %v2482_v9, %v2120_v8  ;;  %v2512_v16 = vld [vmem:[#allocation6 + $0x18c] sm:$0xf] }
  0x2f   :  { %579 = vmatpush.bf16.msra.mxu2 %v2053_v36  ;;  %v2480_v17 = vld [vmem:[#allocation6 + $0x8c] sm:$0xf]  ;;  %v2122_v18 = vld [vmem:[#allocation6 + $0x98] sm:$0xf0]  ;;  %v2249_v19 = vor.u32 %v2514_v11, %v2248_v10  ;;  %v2104_v21 = vld [vmem:[#allocation6 + $0x68] sm:$0xf] }
  0x30   :  { %608 = vmatpush.bf16.msra.mxu3 %v2181_v39  ;;  %522 = vmatmul.bf16.vlgmr.msra.gmra.mxu0 %v2828_v44  ;;  %v2250_v20 = vld [vmem:[#allocation6 + $0x198] sm:$0xf0]  ;;  %v2478_v22 = vld [vmem:[#allocation6 + $0x74] sm:$0xf0]  ;;  %v2232_v24 = vld [vmem:[#allocation6 + $0x168] sm:$0xf]  ;;  %v2125_v28 = vor.u32 %v2480_v17, %v2122_v18 }
  0x31   :  { %630 = vmatpush.bf16.msrb.mxu0 %v2169_v40  ;;  %551 = vmatmul.bf16.vlgmr.msra.gmra.mxu1 %v2830_v49  ;;  %v2458_v23 = vld [vmem:[#allocation4 + $0x14] sm:$0xf0]  ;;  %v2457_v26 = vld [vmem:[#allocation4 + $0x14] sm:$0xf]  ;;  %v2026_v27 = vld [vmem:[#allocation4 + $0x18] sm:$0xf0]  ;;  %v2253_v29 = vor.u32 %v2512_v16, %v2250_v20  ;;  %v2105_v30 = vor.u32 %v2478_v22, %v2104_v21 }
  0x32   :  { %659 = vmatpush.bf16.msrb.mxu1 %v2297_v45  ;;  %580 = vmatmul.bf16.vlgmr.msra.gmra.mxu2 %v2828_v44  ;;  %v2510_v25 = vld [vmem:[#allocation6 + $0x174] sm:$0xf0]  ;;  %v2508_v31 = vld [vmem:[#allocation6 + $0x16c] sm:$0xf]  ;;  %v2106_v33 = vld [vmem:[#allocation6 + $0x78] sm:$0xf0]  ;;  %v2836_v34 = vor.u32 %v2458_v23, %v2024_v13  ;;  %v2838_v39 = vor.u32 %v2457_v26, %v2026_v27 }
  0x33   :  { %609 = vmatmul.bf16.vlgmr.msra.gmra.mxu3 %v2830_v49  ;;  %688 = vmatpush.bf16.msrb.mxu2 %v2173_v52  ;;  %v2476_v32 = vld [vmem:[#allocation6 + $0x6c] sm:$0xf]  ;;  %v2233_v35 = vor.u32 %v2510_v25, %v2232_v24  ;;  %v2234_v36 = vld [vmem:[#allocation6 + $0x178] sm:$0xf0]  ;;  %v2088_v37 = vld [vmem:[#allocation6 + $0x48] sm:$0xf] }
  0x34   :  { %717 = vmatpush.bf16.msrb.mxu3 %v2301_v53  ;;  %v2474_v38 = vld [vmem:[#allocation6 + $0x54] sm:$0xf0]  ;;  %v2216_v40 = vld [vmem:[#allocation6 + $0x148] sm:$0xf]  ;;  %v2109_v42 = vor.u32 %v2476_v32, %v2106_v33  ;;  %v2237_v43 = vor.u32 %v2508_v31, %v2234_v36  ;;  %v2504_v47 = vld [vmem:[#allocation6 + $0x14c] sm:$0xf] }
  0x35   :  { %631 = vmatpush.bf16.msrb.mxu0 %v2153_v54  ;;  %v2506_v41 = vld [vmem:[#allocation6 + $0x154] sm:$0xf0]  ;;  %v2089_v45 = vor.u32 %v2474_v38, %v2088_v37  ;;  %v2218_v48 = vld [vmem:[#allocation6 + $0x158] sm:$0xf0]  ;;  %v2072_v50 = vld [vmem:[#allocation6 + $0x28] sm:$0xf] }
  0x36   :  { %660 = vmatpush.bf16.msrb.mxu1 %v2281_v58  ;;  %v2217_v46 = vor.u32 %v2506_v41, %v2216_v40  ;;  %v2470_v51 = vld [vmem:[#allocation6 + $0x34] sm:$0xf0]  ;;  %v2200_v52 = vld [vmem:[#allocation6 + $0x128] sm:$0xf]  ;;  %v2221_v53 = vor.u32 %v2504_v47, %v2218_v48  ;;  %v2472_v56 = vld [vmem:[#allocation6 + $0x4c] sm:$0xf] }
  0x37   :  { %689 = vmatpush.bf16.msrb.mxu2 %v2157_v0  ;;  %v2073_v54 = vor.u32 %v2470_v51, %v2072_v50  ;;  %v2502_v55 = vld [vmem:[#allocation6 + $0x134] sm:$0xf0]  ;;  %v2090_v57 = vld [vmem:[#allocation6 + $0x58] sm:$0xf0]  ;;  %v2500_v60 = vld [vmem:[#allocation6 + $0x12c] sm:$0xf] }
  0x38   :  { %718 = vmatpush.bf16.msrb.mxu3 %v2285_v1  ;;  %v2201_v58 = vor.u32 %v2502_v55, %v2200_v52  ;;  %v2093_v59 = vor.u32 %v2472_v56, %v2090_v57  ;;  %v2202_v61 = vld [vmem:[#allocation6 + $0x138] sm:$0xf0]  ;;  %v2056_v62 = vld [vmem:[#allocation6 + $0x8] sm:$0xf]  ;;  %v2466_v63 = vld [vmem:[#allocation6 + $0x14] sm:$0xf0] }
  0x39   :  { %632 = vmatpush.bf16.msrb.mxu0 %v2137_v2  ;;  %v2184_v0 = vld [vmem:[#allocation6 + $0x108] sm:$0xf]  ;;  %v2498_v1 = vld [vmem:[#allocation6 + $0x114] sm:$0xf0]  ;;  %v2468_v2 = vld [vmem:[#allocation6 + $0x2c] sm:$0xf]  ;;  %v2205_v4 = vor.u32 %v2500_v60, %v2202_v61  ;;  %v2057_v5 = vor.u32 %v2466_v63, %v2056_v62 }
  0x3a   :  { %661 = vmatpush.bf16.msrb.mxu1 %v2265_v6  ;;  %v2074_v3 = vld [vmem:[#allocation6 + $0x38] sm:$0xf0]  ;;  %v2464_v7 = vld [vmem:[#allocation6 + $0xc] sm:$0xf]  ;;  %v2185_v9 = vor.u32 %v2498_v1, %v2184_v0  ;;  %v2460_v13 = vld [vmem:[#allocation4 + $0x24] sm:$0xf0] }
  0x3b   :  { %690 = vmatpush.bf16.msrb.mxu2 %v2141_v12  ;;  %v2077_v6 = vor.u32 %v2468_v2, %v2074_v3  ;;  %v2058_v8 = vld [vmem:[#allocation6 + $0x18] sm:$0xf0]  ;;  %v2496_v10 = vld [vmem:[#allocation6 + $0x10c] sm:$0xf]  ;;  %v2032_v12 = vld [vmem:[#allocation4 + $0x20] sm:$0xf] }
  0x3c   :  { %719 = vmatpush.bf16.msrb.mxu3 %v2269_v14  ;;  %v2186_v11 = vld [vmem:[#allocation6 + $0x118] sm:$0xf0]  ;;  %v2459_v14 = vld [vmem:[#allocation4 + $0x24] sm:$0xf]  ;;  %v2061_v16 = vor.u32 %v2464_v7, %v2058_v8  ;;  %v2844_v18 = vor.u32 %v2460_v13, %v2032_v12  ;;  %v2416_v20 = vld [vmem:[#allocation8 + $0xe0] sm:$0xf] }
  0x3d   :  { %633 = vmatpush.bf16.msrb.mxu0 %v2121_v15  ;;  %v2034_v15 = vld [vmem:[#allocation4 + $0x28] sm:$0xf0]  ;;  %v2189_v17 = vor.u32 %v2496_v10, %v2186_v11  ;;  %v2557_v21 = vld [vmem:[#allocation8 + $0xec] sm:$0xf0]  ;;  %v2555_v22 = vld [vmem:[#allocation8 + $0xe4] sm:$0xf] }
  0x3e   :  { %662 = vmatpush.bf16.msrb.mxu1 %v2249_v19  ;;  %v2846_v19 = vor.u32 %v2459_v14, %v2034_v15  ;;  %v2852_v23 = vor.u32 %v2557_v21, %v2416_v20  ;;  %v2418_v24 = vld [vmem:[#allocation8 + $0xf0] sm:$0xf0]  ;;  %v2556_v25 = vld [vmem:[#allocation8 + $0xec] sm:$0xf]  ;;  %v2426_v26 = vld [vmem:[#allocation8 + $0xf8] sm:$0xf0] }
  0x3f   :  { %691 = vmatpush.bf16.msrb.mxu2 %v2125_v28  ;;  %v2854_v27 = vor.u32 %v2555_v22, %v2418_v24  ;;  %v2856_v28 = vor.u32 %v2556_v25, %v2426_v26  ;;  %v2551_v31 = vld [vmem:[#allocation8 + $0xc4] sm:$0xf]  ;;  %v2402_v33 = vld [vmem:[#allocation8 + $0xd0] sm:$0xf0]  ;;  %v2410_v36 = vld [vmem:[#allocation8 + $0xd8] sm:$0xf0] }
  0x40   :  { %720 = vmatpush.bf16.msrb.mxu3 %v2253_v29  ;;  %527 = vmatmul.bf16.gmra.mxu0 %v2836_v34  ;;  %v2400_v29 = vld [vmem:[#allocation8 + $0xc0] sm:$0xf]  ;;  %v2863_v37 = vor.u32 %v2551_v31, %v2402_v33  ;;  %v2424_v40 = vld [vmem:[#allocation8 + $0xe8] sm:$0xf]  ;;  %v2558_v41 = vld [vmem:[#allocation8 + $0xf4] sm:$0xf0] }
  0x41   :  { %634 = vmatpush.bf16.msrb.mxu0 %v2105_v30  ;;  %556 = vmatmul.bf16.gmra.mxu1 %v2838_v39  ;;  %v2553_v30 = vld [vmem:[#allocation8 + $0xcc] sm:$0xf0]  ;;  %v2042_v47 = vld [vmem:[#allocation4 + $0x38] sm:$0xf0]  ;;  %v2384_v51 = vld [vmem:[#allocation8 + $0xa0] sm:$0xf] }
  0x42   :  { %663 = vmatpush.bf16.msrb.mxu1 %v2233_v35  ;;  %585 = vmatmul.bf16.gmra.mxu2 %v2836_v34  ;;  %v2859_v32 = vor.u32 %v2553_v30, %v2400_v29  ;;  %v2552_v35 = vld [vmem:[#allocation8 + $0xcc] sm:$0xf]  ;;  %v2549_v52 = vld [vmem:[#allocation8 + $0xac] sm:$0xf0]  ;;  %v2386_v55 = vld [vmem:[#allocation8 + $0xb0] sm:$0xf0] }
  0x43   :  { %614 = vmatmul.bf16.gmra.mxu3 %v2838_v39  ;;  %692 = vmatpush.bf16.msrb.mxu2 %v2109_v42  ;;  %v2865_v38 = vor.u32 %v2552_v35, %v2410_v36  ;;  %v2867_v42 = vor.u32 %v2558_v41, %v2424_v40  ;;  %v2548_v56 = vld [vmem:[#allocation8 + $0xac] sm:$0xf]  ;;  %v2394_v57 = vld [vmem:[#allocation8 + $0xb8] sm:$0xf0]  ;;  %v2408_v60 = vld [vmem:[#allocation8 + $0xc8] sm:$0xf] }
  0x44   :  { %721 = vmatpush.bf16.msrb.mxu3 %v2237_v43  ;;  %v2040_v43 = vld [vmem:[#allocation4 + $0x30] sm:$0xf]  ;;  %v2554_v61 = vld [vmem:[#allocation8 + $0xd4] sm:$0xf0]  ;;  %v2368_v62 = vld [vmem:[#allocation8 + $0x80] sm:$0xf] }
  0x45   :  { %635 = vmatpush.bf16.msrb.mxu0 %v2089_v45  ;;  %v2462_v45 = vld [vmem:[#allocation4 + $0x34] sm:$0xf0]  ;;  %v2888_v63 = vor.u32 %v2554_v61, %v2408_v60  ;;  %v2545_v0 = vld [vmem:[#allocation8 + $0x8c] sm:$0xf0]  ;;  %v2543_v1 = vld [vmem:[#allocation8 + $0x84] sm:$0xf] }
  0x46   :  { %664 = vmatpush.bf16.msrb.mxu1 %v2217_v46  ;;  %v2461_v46 = vld [vmem:[#allocation4 + $0x34] sm:$0xf]  ;;  %v2873_v48 = vor.u32 %v2462_v45, %v2040_v43  ;;  %v2892_v3 = vor.u32 %v2545_v0, %v2368_v62  ;;  %v2392_v7 = vld [vmem:[#allocation8 + $0xa8] sm:$0xf]  ;;  %v2352_v11 = vld [vmem:[#allocation8 + $0x60] sm:$0xf] }
  0x47   :  { %693 = vmatpush.bf16.msrb.mxu2 %v2093_v59  ;;  %v2875_v50 = vor.u32 %v2461_v46, %v2042_v47  ;;  %v2885_v59 = vor.u32 %v2548_v56, %v2394_v57  ;;  %v2370_v2 = vld [vmem:[#allocation8 + $0x90] sm:$0xf0]  ;;  %v2541_v12 = vld [vmem:[#allocation8 + $0x6c] sm:$0xf0]  ;;  %v2539_v13 = vld [vmem:[#allocation8 + $0x64] sm:$0xf] }
  0x48   :  { %722 = vmatpush.bf16.msrb.mxu3 %v2221_v53  ;;  %v2547_v53 = vld [vmem:[#allocation8 + $0xa4] sm:$0xf]  ;;  %v2909_v14 = vor.u32 %v2541_v12, %v2352_v11  ;;  %v2354_v15 = vld [vmem:[#allocation8 + $0x70] sm:$0xf0]  ;;  %v2376_v22 = vld [vmem:[#allocation8 + $0x88] sm:$0xf] }
  0x49   :  { %636 = vmatpush.bf16.msrb.mxu0 %v2073_v54  ;;  %v2881_v54 = vor.u32 %v2549_v52, %v2384_v51  ;;  %v2911_v20 = vor.u32 %v2539_v13, %v2354_v15  ;;  %v2546_v24 = vld [vmem:[#allocation8 + $0x94] sm:$0xf0]  ;;  %v2336_v25 = vld [vmem:[#allocation8 + $0x40] sm:$0xf]  ;;  %v2535_v26 = vld [vmem:[#allocation8 + $0x44] sm:$0xf] }
  0x4a   :  { %665 = vmatpush.bf16.msrb.mxu1 %v2201_v58  ;;  %v2883_v58 = vor.u32 %v2547_v53, %v2386_v55  ;;  %v2338_v29 = vld [vmem:[#allocation8 + $0x50] sm:$0xf0]  ;;  %v2536_v33 = vld [vmem:[#allocation8 + $0x4c] sm:$0xf]  ;;  %v2346_v35 = vld [vmem:[#allocation8 + $0x58] sm:$0xf0] }
  0x4b   :  { %694 = vmatpush.bf16.msrb.mxu2 %v2077_v6  ;;  %v2378_v6 = vld [vmem:[#allocation8 + $0x98] sm:$0xf0]  ;;  %v2922_v31 = vor.u32 %v2535_v26, %v2338_v29  ;;  %v2360_v36 = vld [vmem:[#allocation8 + $0x68] sm:$0xf]  ;;  %v2925_v40 = vor.u32 %v2536_v33, %v2346_v35  ;;  %v2542_v41 = vld [vmem:[#allocation8 + $0x74] sm:$0xf0] }
  0x4c   :  { %723 = vmatpush.bf16.msrb.mxu3 %v2205_v4  ;;  %v2894_v4 = vor.u32 %v2543_v1, %v2370_v2  ;;  %v2927_v43 = vor.u32 %v2542_v41, %v2360_v36  ;;  %v2320_v45 = vld [vmem:[#allocation8 + $0x20] sm:$0xf]  ;;  %v2533_v46 = vld [vmem:[#allocation8 + $0x2c] sm:$0xf0]  ;;  %v2531_v47 = vld [vmem:[#allocation8 + $0x24] sm:$0xf] }
  0x4d   :  { %637 = vmatpush.bf16.msrb.mxu0 %v2057_v5  ;;  %v2544_v5 = vld [vmem:[#allocation8 + $0x8c] sm:$0xf]  ;;  %v2937_v51 = vor.u32 %v2533_v46, %v2320_v45  ;;  %v2322_v52 = vld [vmem:[#allocation8 + $0x30] sm:$0xf0]  ;;  %v2344_v53 = vld [vmem:[#allocation8 + $0x48] sm:$0xf] }
  0x4e   :  { %666 = vmatpush.bf16.msrb.mxu1 %v2185_v9  ;;  %v2897_v8 = vor.u32 %v2544_v5, %v2378_v6  ;;  %v2550_v9 = vld [vmem:[#allocation8 + $0xb4] sm:$0xf0]  ;;  %v2939_v56 = vor.u32 %v2531_v47, %v2322_v52  ;;  %v2532_v60 = vld [vmem:[#allocation8 + $0x2c] sm:$0xf]  ;;  %v2330_v61 = vld [vmem:[#allocation8 + $0x38] sm:$0xf0] }
  0x4f   :  { %695 = vmatpush.bf16.msrb.mxu2 %v2061_v16  ;;  %v2899_v10 = vor.u32 %v2550_v9, %v2392_v7  ;;  %v2540_v16 = vld [vmem:[#allocation8 + $0x6c] sm:$0xf]  ;;  %v2538_v55 = vld [vmem:[#allocation8 + $0x54] sm:$0xf0]  ;;  %v2304_v62 = vld [vmem:[#allocation8] sm:$0xf] }
  0x50   :  { %724 = vmatpush.bf16.msrb.mxu3 %v2189_v17  ;;  %532 = vmatmul.bf16.gmra.mxu0 %v2844_v18  ;;  %v2362_v17 = vld [vmem:[#allocation8 + $0x78] sm:$0xf0]  ;;  %v2941_v57 = vor.u32 %v2538_v55, %v2344_v53  ;;  %v2527_v0 = vld [vmem:[#allocation8 + $0x4] sm:$0xf]  ;;  %v2306_v1 = vld [vmem:[#allocation8 + $0x10] sm:$0xf0] }
  0x51   :  { %561 = vmatmul.bf16.gmra.mxu1 %v2846_v19  ;;  %976 = vmatpush.bf16.msra.mxu0 %v2852_v23  ;;  %v2913_v21 = vor.u32 %v2540_v16, %v2362_v17  ;;  %v2950_v5 = vor.u32 %v2527_v0, %v2306_v1  ;;  %v2328_v6 = vld [vmem:[#allocation8 + $0x28] sm:$0xf]  ;;  %v2534_v7 = vld [vmem:[#allocation8 + $0x34] sm:$0xf0]  ;;  %v2528_v13 = vld [vmem:[#allocation8 + $0xc] sm:$0xf] }
  0x52   :  { %590 = vmatmul.bf16.gmra.mxu2 %v2844_v18  ;;  %989 = vmatpush.bf16.msra.mxu1 %v2854_v27  ;;  %v2953_v9 = vor.u32 %v2534_v7, %v2328_v6  ;;  %v2312_v11 = vld [vmem:[#allocation8 + $0x8] sm:$0xf]  ;;  %v2530_v12 = vld [vmem:[#allocation8 + $0x14] sm:$0xf0]  ;;  %v2314_v16 = vld [vmem:[#allocation8 + $0x18] sm:$0xf0] }
  0x53   :  { %619 = vmatmul.bf16.gmra.mxu3 %v2846_v19  ;;  %1002 = vmatpush.bf16.msra.mxu2 %v2867_v42  ;;  %v2960_v15 = vor.u32 %v2530_v12, %v2312_v11  ;;  %v2962_v17 = vor.u32 %v2528_v13, %v2314_v16 }
  0x54   :  { %1015 = vmatpush.bf16.msra.mxu3 %v2856_v28 }
  0x55   :  { %977 = vmatpush.bf16.msra.mxu0 %v2859_v32 }
  0x56   :  { %990 = vmatpush.bf16.msra.mxu1 %v2863_v37 }
  0x57   :  { %1003 = vmatpush.bf16.msra.mxu2 %v2888_v63 }
  0x58   :  { %1016 = vmatpush.bf16.msra.mxu3 %v2865_v38 }
  0x59   :  { %978 = vmatpush.bf16.msra.mxu0 %v2881_v54 }
  0x5a   :  { %991 = vmatpush.bf16.msra.mxu1 %v2883_v58 }
  0x5b   :  { %1004 = vmatpush.bf16.msra.mxu2 %v2899_v10 }
  0x5c   :  { %1017 = vmatpush.bf16.msra.mxu3 %v2885_v59 }
  0x5d   :  { %979 = vmatpush.bf16.msra.mxu0 %v2892_v3 }
  0x5e   :  { %992 = vmatpush.bf16.msra.mxu1 %v2894_v4 }
  0x60   :  { %537 = vmatmul.bf16.gmra.mxu0 %v2873_v48  ;;  %1018 = vmatpush.bf16.msra.mxu3 %v2897_v8 }
  0x61   :  { %566 = vmatmul.bf16.gmra.mxu1 %v2875_v50  ;;  %980 = vmatpush.bf16.msra.mxu0 %v2909_v14 }
  0x62   :  { %595 = vmatmul.bf16.gmra.mxu2 %v2873_v48  ;;  %993 = vmatpush.bf16.msra.mxu1 %v2911_v20 }
  0x63   :  { %624 = vmatmul.bf16.gmra.mxu3 %v2875_v50 }
  0x64   :  { %1019 = vmatpush.bf16.msra.mxu3 %v2913_v21 }
  0x66   :  { %994 = vmatpush.bf16.msra.mxu1 %v2922_v31 }
  0x68   :  { %1020 = vmatpush.bf16.msra.mxu3 %v2925_v40 }
  0x6a   :  { %995 = vmatpush.bf16.msra.mxu1 %v2939_v56 }
  0x6e   :  { %996 = vmatpush.bf16.msra.mxu1 %v2950_v5 }
  0x70   :  { %638 = vmatmul.bf16.vlgmr.msrb.gmra.mxu0 %v2828_v44 }
  0x71   :  { %667 = vmatmul.bf16.vlgmr.msrb.gmra.mxu1 %v2830_v49 }
  0x72   :  { %696 = vmatmul.bf16.vlgmr.msrb.gmra.mxu2 %v2828_v44  ;;  %v2916_v44 = vor.u32 %v2546_v24, %v2376_v22  ;;  %1115 = vmatpush.bf16.msrb.mxu1 %v2854_v27 }
  0x73   :  { %725 = vmatmul.bf16.vlgmr.msrb.gmra.mxu3 %v2830_v49  ;;  %v2537_v49 = vld [vmem:[#allocation8 + $0x4c] sm:$0xf0] }
  0x74   :  { %v2920_v30 = vor.u32 %v2537_v49, %v2336_v25  ;;  %1005 = vmatpush.bf16.msra.mxu2 %v2916_v44  ;;  %v2783_v25 = vmov 0  }
  0x76   :  { %981 = vmatpush.bf16.msra.mxu0 %v2920_v30  ;;  %1116 = vmatpush.bf16.msrb.mxu1 %v2863_v37 }
  0x78   :  { %1006 = vmatpush.bf16.msra.mxu2 %v2927_v43 }
  0x7a   :  { %982 = vmatpush.bf16.msra.mxu0 %v2937_v51  ;;  %1117 = vmatpush.bf16.msrb.mxu1 %v2883_v58 }
  0x7c   :  { %1007 = vmatpush.bf16.msra.mxu2 %v2941_v57 }
  0x7e   :  { %1118 = vmatpush.bf16.msrb.mxu1 %v2894_v4 }
  0x80   :  { %643 = vmatmul.bf16.gmra.mxu0 %v2836_v34  ;;  %1008 = vmatpush.bf16.msra.mxu2 %v2953_v9 }
  0x81   :  { %672 = vmatmul.bf16.gmra.mxu1 %v2838_v39 }
  0x82   :  { %701 = vmatmul.bf16.gmra.mxu2 %v2836_v34  ;;  %v2944_v34 = vor.u32 %v2532_v60, %v2330_v61  ;;  %1119 = vmatpush.bf16.msrb.mxu1 %v2911_v20 }
  0x83   :  { %730 = vmatmul.bf16.gmra.mxu3 %v2838_v39  ;;  %v2529_v39 = vld [vmem:[#allocation8 + $0xc] sm:$0xf0] }
  0x84   :  { %v2948_v2 = vor.u32 %v2529_v39, %v2304_v62  ;;  %1021 = vmatpush.bf16.msra.mxu3 %v2944_v34  ;;  %1009 = vmatpush.bf16.msra.mxu2 %v2960_v15 }
  0x86   :  { %983 = vmatpush.bf16.msra.mxu0 %v2948_v2  ;;  %1120 = vmatpush.bf16.msrb.mxu1 %v2922_v31 }
  0x88   :  { %1022 = vmatpush.bf16.msra.mxu3 %v2962_v17  ;;  %1128 = vmatpush.bf16.msrb.mxu2 %v2867_v42 }
  0x8a   :  { %1102 = vmatpush.bf16.msrb.mxu0 %v2852_v23  ;;  %1121 = vmatpush.bf16.msrb.mxu1 %v2939_v56 }
  0x8c   :  { %1141 = vmatpush.bf16.msrb.mxu3 %v2856_v28  ;;  %1129 = vmatpush.bf16.msrb.mxu2 %v2888_v63 }
  0x8e   :  { %1103 = vmatpush.bf16.msrb.mxu0 %v2859_v32  ;;  %1122 = vmatpush.bf16.msrb.mxu1 %v2950_v5 }
  0x90   :  { %648 = vmatmul.bf16.gmra.mxu0 %v2844_v18  ;;  %1142 = vmatpush.bf16.msrb.mxu3 %v2865_v38 }
  0x91   :  { %677 = vmatmul.bf16.gmra.mxu1 %v2846_v19  ;;  %1130 = vmatpush.bf16.msrb.mxu2 %v2899_v10 }
  0x92   :  { %706 = vmatmul.bf16.gmra.mxu2 %v2844_v18  ;;  %1104 = vmatpush.bf16.msrb.mxu0 %v2881_v54  ;;  %v2998_v18 = vld [vmem:[%s3338_s3] sm:$0xf] }
  0x93   :  { %735 = vmatmul.bf16.gmra.mxu3 %v2846_v19  ;;  %v3004_v19 = vperm.slane %v2998_v18, 0  ;;  %v3014_v49 = vperm.slane %v2998_v18, 1 }
  0x94   :  { %1143 = vmatpush.bf16.msrb.mxu3 %v2885_v59 }
  0x95   :  { %1131 = vmatpush.bf16.msrb.mxu2 %v2916_v44 }
  0x96   :  { %1105 = vmatpush.bf16.msrb.mxu0 %v2892_v3 }
  0x98   :  { %1144 = vmatpush.bf16.msrb.mxu3 %v2897_v8 }
  0x99   :  { %1132 = vmatpush.bf16.msrb.mxu2 %v2927_v43 }
  0x9a   :  { %1106 = vmatpush.bf16.msrb.mxu0 %v2909_v14 }
  0x9c   :  { %1145 = vmatpush.bf16.msrb.mxu3 %v2913_v21 }
  0x9d   :  { %1133 = vmatpush.bf16.msrb.mxu2 %v2941_v57 }
  0x9e   :  { %1107 = vmatpush.bf16.msrb.mxu0 %v2920_v30 }
  0xa0   :  { %653 = vmatmul.bf16.gmra.mxu0 %v2873_v48  ;;  %1146 = vmatpush.bf16.msrb.mxu3 %v2925_v40 }
  0xa1   :  { %682 = vmatmul.bf16.gmra.mxu1 %v2875_v50  ;;  %1134 = vmatpush.bf16.msrb.mxu2 %v2953_v9 }
  0xa2   :  { %711 = vmatmul.bf16.gmra.mxu2 %v2873_v48  ;;  %1108 = vmatpush.bf16.msrb.mxu0 %v2937_v51 }
  0xa3   :  { %740 = vmatmul.bf16.gmra.mxu3 %v2875_v50 }
  0xa4   :  { %1147 = vmatpush.bf16.msrb.mxu3 %v2944_v34 }
  0xa5   :  { %1135 = vmatpush.bf16.msrb.mxu2 %v2960_v15 }
  0xa6   :  { %1109 = vmatpush.bf16.msrb.mxu0 %v2948_v2 }
  0xa8   :  { %1148 = vmatpush.bf16.msrb.mxu3 %v2962_v17 }
  0xad   :  { %v523_v48 = vpop.f32.mrf.mxu0 }
  0xae   :  { %v524_v50 = vadd.f32 %v523_v48, %v3004_v19  ;;  %v552_v22 = vpop.f32.mrf.mxu1 }
  0xb0   :  { %v553_v24 = vadd.f32 %v552_v22, %v524_v50  ;;  %984 = vmatmul.bf16.vlgmr.msra.gmra.mxu0 %v2783_v25 }
  0xb1   :  { %997 = vmatmul.bf16.vlgmr.msra.gmra.mxu1 %v2783_v25  ;;  %1228 = vmatpush.bf16.msra.mxu0 %v2852_v23 }
  0xb2   :  { %1010 = vmatmul.bf16.vlgmr.msra.gmra.mxu2 %v2783_v25  ;;  %1241 = vmatpush.bf16.msra.mxu1 %v2854_v27 }
  0xb3   :  { %1023 = vmatmul.bf16.vlgmr.msra.gmra.mxu3 %v2783_v25  ;;  %1254 = vmatpush.bf16.msra.mxu2 %v2867_v42 }
  0xb4   :  { %1267 = vmatpush.bf16.msra.mxu3 %v2856_v28 }
  0xb5   :  { %v581_v26 = vpop.f32.mrf.mxu2  ;;  %v525_v35 = vpop.f32.mrf.mxu0  ;;  %1229 = vmatpush.bf16.msra.mxu0 %v2859_v32 }
  0xb6   :  { %v582_v29 = vadd.f32 %v581_v26, %v3014_v49  ;;  %v610_v33 = vpop.f32.mrf.mxu3  ;;  %v554_v36 = vpop.f32.mrf.mxu1  ;;  %1242 = vmatpush.bf16.msra.mxu1 %v2863_v37  ;;  %v526_v46 = vadd.f32 %v525_v35, %v3004_v19 }
  0xb7   :  { %1255 = vmatpush.bf16.msra.mxu2 %v2888_v63 }
  0xb8   :  { %v611_v41 = vadd.f32 %v610_v33, %v582_v29  ;;  %1268 = vmatpush.bf16.msra.mxu3 %v2865_v38  ;;  %v555_v62 = vadd.f32 %v554_v36, %v526_v46 }
  0xb9   :  { %1230 = vmatpush.bf16.msra.mxu0 %v2881_v54 }
  0xba   :  { %v3025_v45 = vpack.c.bf16 %v611_v41, %v553_v24  ;;  %1243 = vmatpush.bf16.msra.mxu1 %v2883_v58 }
  0xbb   :  { %1256 = vmatpush.bf16.msra.mxu2 %v2899_v10 }
  0xbc   :  { %1269 = vmatpush.bf16.msra.mxu3 %v2885_v59 }
  0xbd   :  { %v583_v47 = vpop.f32.mrf.mxu2  ;;  %v528_v55 = vpop.f32.mrf.mxu0  ;;  %1231 = vmatpush.bf16.msra.mxu0 %v2892_v3 }
  0xbe   :  { %v584_v52 = vadd.f32 %v583_v47, %v3014_v49  ;;  %v612_v53 = vpop.f32.mrf.mxu3  ;;  %v529_v60 = vadd.f32 %v528_v55, %v3004_v19  ;;  %v557_v61 = vpop.f32.mrf.mxu1  ;;  %1244 = vmatpush.bf16.msra.mxu1 %v2894_v4 }
  0xbf   :  { %1257 = vmatpush.bf16.msra.mxu2 %v2916_v44 }
  0xc0   :  { %v613_v39 = vadd.f32 %v612_v53, %v584_v52  ;;  %v558_v0 = vadd.f32 %v557_v61, %v529_v60  ;;  %1270 = vmatpush.bf16.msra.mxu3 %v2897_v8 }
  0xc1   :  { %1232 = vmatpush.bf16.msra.mxu0 %v2909_v14 }
  0xc2   :  { %v3038_v1 = vpack.c.bf16 %v613_v39, %v555_v62  ;;  %1245 = vmatpush.bf16.msra.mxu1 %v2911_v20 }
  0xc3   :  { %1258 = vmatpush.bf16.msra.mxu2 %v2927_v43 }
  0xc4   :  { %1271 = vmatpush.bf16.msra.mxu3 %v2913_v21 }
  0xc5   :  { %v586_v6 = vpop.f32.mrf.mxu2  ;;  %v530_v12 = vpop.f32.mrf.mxu0  ;;  %1233 = vmatpush.bf16.msra.mxu0 %v2920_v30 }
  0xc6   :  { %v587_v7 = vadd.f32 %v586_v6, %v3014_v49  ;;  %v615_v11 = vpop.f32.mrf.mxu3  ;;  %v559_v13 = vpop.f32.mrf.mxu1  ;;  %1246 = vmatpush.bf16.msra.mxu1 %v2922_v31  ;;  %v531_v50 = vadd.f32 %v530_v12, %v3004_v19 }
  0xc7   :  { %1259 = vmatpush.bf16.msra.mxu2 %v2941_v57 }
  0xc8   :  { %v616_v16 = vadd.f32 %v615_v11, %v587_v7  ;;  %1272 = vmatpush.bf16.msra.mxu3 %v2925_v40  ;;  %v560_v35 = vadd.f32 %v559_v13, %v531_v50 }
  0xc9   :  { %1234 = vmatpush.bf16.msra.mxu0 %v2937_v51 }
  0xca   :  { %v3049_v48 = vpack.c.bf16 %v616_v16, %v558_v0  ;;  %1247 = vmatpush.bf16.msra.mxu1 %v2939_v56 }
  0xcb   :  { %1260 = vmatpush.bf16.msra.mxu2 %v2953_v9 }
  0xcc   :  { %1273 = vmatpush.bf16.msra.mxu3 %v2944_v34 }
  0xcd   :  { %v588_v22 = vpop.f32.mrf.mxu2  ;;  %v533_v26 = vpop.f32.mrf.mxu0  ;;  %1235 = vmatpush.bf16.msra.mxu0 %v2948_v2 }
  0xce   :  { %v589_v24 = vadd.f32 %v588_v22, %v3014_v49  ;;  %v617_v25 = vpop.f32.mrf.mxu3  ;;  %v534_v29 = vadd.f32 %v533_v26, %v3004_v19  ;;  %v562_v33 = vpop.f32.mrf.mxu1  ;;  %1248 = vmatpush.bf16.msra.mxu1 %v2950_v5 }
  0xcf   :  { %1261 = vmatpush.bf16.msra.mxu2 %v2960_v15 }
  0xd0   :  { %v618_v36 = vadd.f32 %v617_v25, %v589_v24  ;;  %v563_v41 = vadd.f32 %v562_v33, %v534_v29  ;;  %1274 = vmatpush.bf16.msra.mxu3 %v2962_v17 }
  0xd2   :  { %v3062_v46 = vpack.c.bf16 %v618_v36, %v560_v35 }
  0xd5   :  { %v591_v47 = vpop.f32.mrf.mxu2  ;;  %v535_v55 = vpop.f32.mrf.mxu0 }
  0xd6   :  { %v592_v52 = vadd.f32 %v591_v47, %v3014_v49  ;;  %v620_v53 = vpop.f32.mrf.mxu3  ;;  %v564_v60 = vpop.f32.mrf.mxu1  ;;  %v536_v39 = vadd.f32 %v535_v55, %v3004_v19  ;;  %v3076_v47 = vperm.slane %v2998_v18, 2 }
  0xd8   :  { %v621_v61 = vadd.f32 %v620_v53, %v592_v52  ;;  %v565_v16 = vadd.f32 %v564_v60, %v536_v39 }
  0xda   :  { %v3065_v62 = vpack.c.bf16 %v621_v61, %v563_v41 }
  0xdc   :  { %3349 = vst [vmem:[#allocation11_spill] sm:$0xff] %v3065_v62 }
  0xdd   :  { %v593_v0 = vpop.f32.mrf.mxu2  ;;  %v538_v11 = vpop.f32.mrf.mxu0 }
  0xde   :  { %v594_v6 = vadd.f32 %v593_v0, %v3014_v49  ;;  %v622_v7 = vpop.f32.mrf.mxu3  ;;  %v539_v12 = vadd.f32 %v538_v11, %v3004_v19  ;;  %v567_v13 = vpop.f32.mrf.mxu1 }
  0xe0   :  { %v623_v50 = vadd.f32 %v622_v7, %v594_v6  ;;  %v568_v22 = vadd.f32 %v567_v13, %v539_v12 }
  0xe2   :  { %v3070_v24 = vpack.c.bf16 %v623_v50, %v565_v16 }
  0xe4   :  { %3350 = vst [vmem:[#allocation12_spill] sm:$0xff] %v3070_v24 }
  0xe5   :  { %v596_v25 = vpop.f32.mrf.mxu2  ;;  %v540_v33 = vpop.f32.mrf.mxu0 }
  0xe6   :  { %v597_v26 = vadd.f32 %v596_v25, %v3014_v49  ;;  %v625_v29 = vpop.f32.mrf.mxu3  ;;  %v569_v35 = vpop.f32.mrf.mxu1  ;;  %v541_v52 = vadd.f32 %v540_v33, %v3004_v19 }
  0xe8   :  { %v626_v36 = vadd.f32 %v625_v29, %v597_v26  ;;  %v570_v6 = vadd.f32 %v569_v35, %v541_v52 }
  0xea   :  { %v3073_v41 = vpack.c.bf16 %v626_v36, %v568_v22 }
  0xec   :  { %3351 = vst [vmem:[#allocation13_spill] sm:$0xff] %v3073_v41 }
  0xed   :  { %v598_v53 = vpop.f32.mrf.mxu2  ;;  %v639_v61 = vpop.f32.mrf.mxu0 }
  0xee   :  { %v599_v55 = vadd.f32 %v598_v53, %v3014_v49  ;;  %v627_v60 = vpop.f32.mrf.mxu3  ;;  %v640_v39 = vadd.f32 %v639_v61, %v3076_v47  ;;  %v668_v0 = vpop.f32.mrf.mxu1  ;;  %v149_v49 = vperm.slane %v2998_v18, 3 }
  0xf0   :  { %v628_v7 = vadd.f32 %v627_v60, %v599_v55  ;;  %v3081_v11 = vadd.f32 %v668_v0, %v640_v39 }
  0xf2   :  { %v3083_v12 = vpack.c.bf16 %v628_v7, %v570_v6 }
  0xf4   :  { %3352 = vst [vmem:[#allocation14_spill] sm:$0xff] %v3083_v12 }
  0xf5   :  { %v697_v13 = vpop.f32.mrf.mxu2  ;;  %v641_v50 = vpop.f32.mrf.mxu0 }
  0xf6   :  { %v726_v16 = vpop.f32.mrf.mxu3  ;;  %v642_v22 = vadd.f32 %v641_v50, %v3076_v47  ;;  %v670_v19 = vpop.f32.mrf.mxu1 }
  0xf8   :  { %v671_v25 = vadd.f32 %v670_v19, %v642_v22 }
  0xfd   :  { %v699_v26 = vpop.f32.mrf.mxu2  ;;  %v644_v36 = vpop.f32.mrf.mxu0 }
  0xfe   :  { %v700_v29 = vadd.f32 %v699_v26, %v149_v49  ;;  %v728_v33 = vpop.f32.mrf.mxu3  ;;  %v645_v35 = vadd.f32 %v644_v36, %v3076_v47  ;;  %v673_v52 = vpop.f32.mrf.mxu1 }
 0x100   :  { %v729_v53 = vadd.f32 %v728_v33, %v700_v29  ;;  %v674_v55 = vadd.f32 %v673_v52, %v645_v35 }
 0x102   :  { %v3088_v60 = vpack.c.bf16 %v729_v53, %v671_v25 }
 0x105   :  { %v702_v61 = vpop.f32.mrf.mxu2  ;;  %v646_v6 = vpop.f32.mrf.mxu0 }
 0x106   :  { %v703_v39 = vadd.f32 %v702_v61, %v149_v49  ;;  %v731_v0 = vpop.f32.mrf.mxu3  ;;  %v647_v7 = vadd.f32 %v646_v6, %v3076_v47  ;;  %v675_v50 = vpop.f32.mrf.mxu1 }
 0x108   :  { %v732_v22 = vadd.f32 %v731_v0, %v703_v39  ;;  %v676_v18 = vadd.f32 %v675_v50, %v647_v7 }
 0x10a   :  { %v3091_v19 = vpack.c.bf16 %v732_v22, %v674_v55 }
 0x10d   :  { %v704_v26 = vpop.f32.mrf.mxu2  ;;  %v649_v36 = vpop.f32.mrf.mxu0 }
 0x10e   :  { %v705_v12 = vadd.f32 %v704_v26, %v149_v49  ;;  %v733_v41 = vpop.f32.mrf.mxu3  ;;  %v650_v29 = vadd.f32 %v649_v36, %v3076_v47  ;;  %v678_v33 = vpop.f32.mrf.mxu1 }
 0x110   :  { %v734_v25 = vadd.f32 %v733_v41, %v705_v12  ;;  %v679_v35 = vadd.f32 %v678_v33, %v650_v29 }
 0x112   :  { %v3094_v52 = vpack.c.bf16 %v734_v25, %v676_v18 }
 0x114   :  { %3353 = vst [vmem:[#allocation15_spill] sm:$0xff] %v3094_v52 }
 0x115   :  { %v707_v53 = vpop.f32.mrf.mxu2  ;;  %v651_v6 = vpop.f32.mrf.mxu0 }
 0x116   :  { %v708_v61 = vadd.f32 %v707_v53, %v149_v49  ;;  %v736_v24 = vpop.f32.mrf.mxu3  ;;  %v652_v39 = vadd.f32 %v651_v6, %v3076_v47  ;;  %v680_v0 = vpop.f32.mrf.mxu1 }
 0x118   :  { %v737_v55 = vadd.f32 %v736_v24, %v708_v61  ;;  %v681_v7 = vadd.f32 %v680_v0, %v652_v39  ;;  %v698_v39 = vadd.f32 %v697_v13, %v149_v49 }
 0x11a   :  { %v3097_v50 = vpack.c.bf16 %v737_v55, %v679_v35 }
 0x11c   :  { %3354 = vst [vmem:[#allocation16_spill] sm:$0xff] %v3097_v50 }
 0x11d   :  { %v709_v22 = vpop.f32.mrf.mxu2  ;;  %v654_v36 = vpop.f32.mrf.mxu0 }
 0x11e   :  { %v710_v26 = vadd.f32 %v709_v22, %v149_v49  ;;  %v738_v62 = vpop.f32.mrf.mxu3  ;;  %v655_v41 = vadd.f32 %v654_v36, %v3076_v47  ;;  %v683_v12 = vpop.f32.mrf.mxu1  ;;  %v727_v22 = vadd.f32 %v726_v16, %v698_v39  ;;  %v780_v36 = vunpack.c.l.bf16 %v3025_v45 }
 0x120   :  { %v739_v18 = vadd.f32 %v738_v62, %v710_v26  ;;  %v684_v29 = vadd.f32 %v683_v12, %v655_v41  ;;  %v781_v41 = vunpack.c.h.bf16 %v3025_v45 }
 0x122   :  { %v3100_v33 = vpack.c.bf16 %v739_v18, %v681_v7 }
 0x124   :  { %3355 = vst [vmem:[#allocation17_spill] sm:$0xff] %v3100_v33 }
 0x125   :  { %v712_v25 = vpop.f32.mrf.mxu2  ;;  %v656_v6 = vpop.f32.mrf.mxu0 }
 0x126   :  { %v713_v53 = vadd.f32 %v712_v25, %v149_v49  ;;  %v741_v52 = vpop.f32.mrf.mxu3  ;;  %v657_v24 = vadd.f32 %v656_v6, %v3076_v47  ;;  %v685_v61 = vpop.f32.mrf.mxu1  ;;  %v747_v47 = vpack.c.bf16 %v727_v22, %v3081_v11 }
 0x128   :  { %v742_v35 = vadd.f32 %v741_v52, %v713_v53  ;;  %v686_v0 = vadd.f32 %v685_v61, %v657_v24  ;;  %v783_v53 = vunpack.c.h.bf16 %v747_v47  ;;  %v782_v22 = vunpack.c.l.bf16 %v747_v47 }
 0x12a   :  { %v3103_v55 = vpack.c.bf16 %v742_v35, %v684_v29 }
 0x12d   :  { %v714_v50 = vpop.f32.mrf.mxu2  ;;  %v985_v7 = vpop.f32.mrf.mxu0 }
 0x12e   :  { %v715_v62 = vadd.f32 %v714_v50, %v149_v49  ;;  %v743_v26 = vpop.f32.mrf.mxu3  ;;  %v1028_v12 = vadd.f32 %v985_v7, %v780_v36  ;;  %v998_v18 = vpop.f32.mrf.mxu1 }
 0x12f   :  { %v1029_v33 = vadd.f32 %v998_v18, %v781_v41 }
 0x130   :  { %v744_v25 = vadd.f32 %v743_v26, %v715_v62  ;;  %v2430_v52 = vmul.f32 -1.442695, %v1028_v12 }
 0x131   :  { %v2431_v29 = vmul.f32 -1.442695, %v1029_v33 }
 0x132   :  { %v3108_v13 = vpack.c.bf16 %v744_v25, %v686_v0  ;;  %2568 = vpow2.f32 %v2430_v52 }
 0x133   :  { %2570 = vpow2.f32 %v2431_v29 }
 0x135   :  { %v1011_v16 = vpop.f32.mrf.mxu2  ;;  %v987_v49 = vpop.f32.mrf.mxu0 }
 0x136   :  { %v1024_v6 = vpop.f32.mrf.mxu3  ;;  %v1000_v24 = vpop.f32.mrf.mxu1  ;;  %v1030_v26 = vadd.f32 %v1011_v16, %v782_v22 }
 0x137   :  { %v1031_v50 = vadd.f32 %v1024_v6, %v783_v53 }
 0x138   :  { %v2569_v61 = vpop.eup %2568 }
 0x139   :  { %v2432_v45 = vmul.f32 -1.442695, %v1031_v50  ;;  %v2571_v35 = vpop.eup %2570  ;;  %v1035_v39 = vadd.f32 1.0, %v2569_v61 }
 0x13a   :  { %v1054_v36 = vadd.f32 1.0, %v2571_v35 }
 0x13b   :  { %2572 = vpow2.f32 %v2432_v45  ;;  %v1047_v29 = vand.u32 2147483648, %v1035_v39  ;;  %v1045_v49 = vand.u32 2147483647, %v1035_v39  ;;  %vm1041_vm2 = vweird.f32 %v1035_v39 }
 0x13c   :  { %2574 = vrcp.f32 %v1035_v39  ;;  %v1066_v53 = vand.u32 2147483648, %v1054_v36  ;;  %v1064_v24 = vand.u32 2147483647, %v1054_v36  ;;  %vm1060_vm3 = vweird.f32 %v1054_v36 }
 0x13d   :  { %2576 = vrcp.f32 %v1054_v36  ;;  %v1013_v11 = vpop.f32.mrf.mxu2  ;;  %v1048_v16 = vor.u32 1.1754944e-38, %v1047_v29  ;;  %vm1046_vm5 = vcmp.eq.f32.partialorder %v1045_v49, 8.507059e+37 }
 0x13e   :  { %v1026_v0 = vpop.f32.mrf.mxu3  ;;  %v1067_v35 = vor.u32 1.1754944e-38, %v1066_v53  ;;  %vm1065_vm7 = vcmp.eq.f32.partialorder %v1064_v24, 8.507059e+37 }
 0x141   :  { %v2573_v33 = vpop.eup %2572 }
 0x142   :  { %v2575_v62 = vpop.eup %2574  ;;  %v1074_v7 = vadd.f32 1.0, %v2573_v33 }
 0x143   :  { %v2577_v41 = vpop.eup %2576  ;;  %v1037_v12 = vmul.f32 %v2575_v62, %v1035_v39  ;;  %vm1042_vm0 = vweird.f32 %v2575_v62 }
 0x144   :  { %v1056_v18 = vmul.f32 %v2577_v41, %v1054_v36  ;;  %2578 = vrcp.f32 %v1074_v7  ;;  %vm1061_vm1 = vweird.f32 %v2577_v41  ;;  %vm1043_vm4 = vmor %vm1041_vm2, %vm1042_vm0  ;;  %v1086_v29 = vand.u32 2147483648, %v1074_v7 }
 0x145   :  { %v1038_v25 = vsub.f32 1.0, %v1037_v12  ;;  %2580 = vtanh.f32 %v1030_v26  ;;  %vm1062_vm6 = vmor %vm1060_vm3, %vm1061_vm1  ;;  %vm1080_vm9 = vweird.f32 %v1074_v7 }
 0x146   :  { %v1057_v52 = vsub.f32 1.0, %v1056_v18  ;;  %v1087_v49 = vor.u32 1.1754944e-38, %v1086_v29 }
 0x147   :  { %v1039_v6 = vmul.f32 %v2575_v62, %v1038_v25 }
 0x148   :  { %v1058_v50 = vmul.f32 %v2577_v41, %v1057_v52 }
 0x149   :  { %v1040_v47 = vadd.f32 %v2575_v62, %v1039_v6 }
 0x14a   :  { %v2579_v61 = vpop.eup %2578  ;;  %v1059_v45 = vadd.f32 %v2577_v41, %v1058_v50 }
 0x14b   :  { %v1044_v11 = vsel %vm1043_vm4, %v2575_v62, %v1040_v47  ;;  %v1076_v0 = vmul.f32 %v2579_v61, %v1074_v7  ;;  %v2581_v22 = vpop.eup %2580  ;;  %vm1081_vm8 = vweird.f32 %v2579_v61  ;;  %v1084_v62 = vand.u32 2147483647, %v1074_v7 }
 0x14c   :  { %v1049_v33 = vsel %vm1046_vm5, %v1048_v16, %v1044_v11  ;;  %v1063_v26 = vsel %vm1062_vm6, %v2577_v41, %v1059_v45  ;;  %vm1082_vm10 = vmor %vm1080_vm9, %vm1081_vm8  ;;  %v1097_v7 = vunpack.c.l.bf16 %v3038_v1 }
 0x14d   :  { %v1068_v12 = vsel %vm1065_vm7, %v1067_v35, %v1063_v26  ;;  %v1091_v18 = vmul.f32 %v2581_v22, %v1049_v33  ;;  %v1077_v25 = vsub.f32 1.0, %v1076_v0  ;;  %vm1085_vm11 = vcmp.eq.f32.partialorder %v1084_v62, 8.507059e+37 }
 0x14e   :  { %v1090_v52 = vmul.f32 0.0, %v1068_v12  ;;  %v1100_v33 = vunpack.c.h.bf16 %v3088_v60 }
 0x14f   :  { %v1078_v6 = vmul.f32 %v2579_v61, %v1077_v25 }
 0x150   :  { %v3110_v39 = vadd.f32 %v1091_v18, %v1090_v52 }
 0x151   :  { %v1079_v36 = vadd.f32 %v2579_v61, %v1078_v6 }
 0x152   :  { %2582 = vtanh.f32 %v3110_v39 }
 0x153   :  { %v1083_v53 = vsel %vm1082_vm10, %v2579_v61, %v1079_v36  ;;  %v1098_v61 = vunpack.c.h.bf16 %v3038_v1 }
 0x154   :  { %v1088_v50 = vsel %vm1085_vm11, %v1087_v49, %v1083_v53 }
 0x158   :  { %v2583_v41 = vpop.eup %2582 }
 0x159   :  { %v1094_v24 = vmul.f32 %v2583_v41, %v1088_v50  ;;  %v1099_v50 = vunpack.c.l.bf16 %v3088_v60 }
 0x15b   :  { %v1101_v47 = vpack.c.bf16 %v1094_v24, %v1094_v24 }
 0x15d   :  { %1110 = vmatmul.bf16.vlgmr.msrb.gmra.mxu0 %v1101_v47  ;;  %1123 = vmatmul.bf16.vlgmr.msrb.gmra.mxu1 %v1101_v47 }
 0x15e   :  { %1136 = vmatmul.bf16.vlgmr.msrb.gmra.mxu2 %v1101_v47  ;;  %1149 = vmatmul.bf16.vlgmr.msrb.gmra.mxu3 %v1101_v47 }
 0x15f   :  { %1354 = vmatpush.bf16.msrb.mxu0 %v2852_v23  ;;  %1367 = vmatpush.bf16.msrb.mxu1 %v2854_v27 }
 0x160   :  { %1380 = vmatpush.bf16.msrb.mxu2 %v2867_v42  ;;  %1393 = vmatpush.bf16.msrb.mxu3 %v2856_v28 }
 0x163   :  { %1355 = vmatpush.bf16.msrb.mxu0 %v2859_v32  ;;  %1368 = vmatpush.bf16.msrb.mxu1 %v2863_v37 }
 0x164   :  { %1381 = vmatpush.bf16.msrb.mxu2 %v2888_v63  ;;  %1394 = vmatpush.bf16.msrb.mxu3 %v2865_v38 }
 0x167   :  { %1356 = vmatpush.bf16.msrb.mxu0 %v2881_v54  ;;  %1369 = vmatpush.bf16.msrb.mxu1 %v2883_v58 }
 0x168   :  { %1382 = vmatpush.bf16.msrb.mxu2 %v2899_v10  ;;  %1395 = vmatpush.bf16.msrb.mxu3 %v2885_v59 }
 0x16b   :  { %1357 = vmatpush.bf16.msrb.mxu0 %v2892_v3  ;;  %1370 = vmatpush.bf16.msrb.mxu1 %v2894_v4 }
 0x16c   :  { %1383 = vmatpush.bf16.msrb.mxu2 %v2916_v44  ;;  %1396 = vmatpush.bf16.msrb.mxu3 %v2897_v8 }
 0x16f   :  { %1358 = vmatpush.bf16.msrb.mxu0 %v2909_v14  ;;  %1371 = vmatpush.bf16.msrb.mxu1 %v2911_v20 }
 0x170   :  { %1384 = vmatpush.bf16.msrb.mxu2 %v2927_v43  ;;  %1397 = vmatpush.bf16.msrb.mxu3 %v2913_v21 }
 0x173   :  { %1359 = vmatpush.bf16.msrb.mxu0 %v2920_v30  ;;  %1372 = vmatpush.bf16.msrb.mxu1 %v2922_v31 }
 0x174   :  { %1385 = vmatpush.bf16.msrb.mxu2 %v2941_v57  ;;  %1398 = vmatpush.bf16.msrb.mxu3 %v2925_v40 }
 0x177   :  { %1360 = vmatpush.bf16.msrb.mxu0 %v2937_v51  ;;  %1373 = vmatpush.bf16.msrb.mxu1 %v2939_v56 }
 0x178   :  { %1386 = vmatpush.bf16.msrb.mxu2 %v2953_v9  ;;  %1399 = vmatpush.bf16.msrb.mxu3 %v2944_v34 }
 0x17b   :  { %1361 = vmatpush.bf16.msrb.mxu0 %v2948_v2  ;;  %1374 = vmatpush.bf16.msrb.mxu1 %v2950_v5 }
 0x17c   :  { %1387 = vmatpush.bf16.msrb.mxu2 %v2960_v15  ;;  %1400 = vmatpush.bf16.msrb.mxu3 %v2962_v17 }
 0x1da   :  { %v1111_v16 = vpop.f32.mrf.mxu0  ;;  %v1124_v45 = vpop.f32.mrf.mxu1 }
 0x1db   :  { %v1154_v35 = vadd.f32 %v1111_v16, %v1097_v7  ;;  %v1155_v11 = vadd.f32 %v1124_v45, %v1098_v61 }
 0x1dd   :  { %v2433_v0 = vmul.f32 -1.442695, %v1154_v35  ;;  %v2434_v22 = vmul.f32 -1.442695, %v1155_v11 }
 0x1df   :  { %2584 = vpow2.f32 %v2433_v0 }
 0x1e0   :  { %2586 = vpow2.f32 %v2434_v22 }
 0x1e1   :  { %v1137_v26 = vpop.f32.mrf.mxu2  ;;  %v1150_v12 = vpop.f32.mrf.mxu3 }
 0x1e2   :  { %v1157_v18 = vadd.f32 %v1150_v12, %v1100_v33  ;;  %v1113_v25 = vpop.f32.mrf.mxu0  ;;  %v1126_v52 = vpop.f32.mrf.mxu1  ;;  %v1156_v7 = vadd.f32 %v1137_v26, %v1099_v50 }
 0x1e4   :  { %v2435_v6 = vmul.f32 -1.442695, %v1157_v18 }
 0x1e5   :  { %v2585_v36 = vpop.eup %2584 }
 0x1e6   :  { %v2587_v29 = vpop.eup %2586  ;;  %v1161_v62 = vadd.f32 1.0, %v2585_v36  ;;  %2588 = vpow2.f32 %v2435_v6 }
 0x1e7   :  { %v1180_v1 = vadd.f32 1.0, %v2587_v29 }
 0x1e8   :  { %2590 = vrcp.f32 %v1161_v62  ;;  %v1173_v0 = vand.u32 2147483648, %v1161_v62  ;;  %v1171_v12 = vand.u32 2147483647, %v1161_v62  ;;  %vm1167_vm14 = vweird.f32 %v1161_v62 }
 0x1e9   :  { %2592 = vrcp.f32 %v1180_v1  ;;  %v1139_v53 = vpop.f32.mrf.mxu2  ;;  %v1152_v49 = vpop.f32.mrf.mxu3  ;;  %v1192_v22 = vand.u32 2147483648, %v1180_v1  ;;  %v1190_v25 = vand.u32 2147483647, %v1180_v1  ;;  %vm1186_vm15 = vweird.f32 %v1180_v1 }
 0x1ea   :  { %v1174_v26 = vor.u32 1.1754944e-38, %v1173_v0  ;;  %vm1172_vm2 = vcmp.eq.f32.partialorder %v1171_v12, 8.507059e+37 }
 0x1eb   :  { %v1193_v29 = vor.u32 1.1754944e-38, %v1192_v22  ;;  %vm1191_vm3 = vcmp.eq.f32.partialorder %v1190_v25, 8.507059e+37 }
 0x1ec   :  { %v2589_v41 = vpop.eup %2588 }
 0x1ed   :  { %v1200_v24 = vadd.f32 1.0, %v2589_v41 }
 0x1ee   :  { %v2591_v47 = vpop.eup %2590 }
 0x1ef   :  { %v2593_v61 = vpop.eup %2592  ;;  %v1163_v16 = vmul.f32 %v2591_v47, %v1161_v62  ;;  %2594 = vrcp.f32 %v1200_v24  ;;  %vm1168_vm12 = vweird.f32 %v2591_v47  ;;  %v1212_v0 = vand.u32 2147483648, %v1200_v24 }
 0x1f0   :  { %v1182_v45 = vmul.f32 %v2593_v61, %v1180_v1  ;;  %2596 = vtanh.f32 %v1156_v7  ;;  %vm1187_vm13 = vweird.f32 %v2593_v61  ;;  %vm1169_vm0 = vmor %vm1167_vm14, %vm1168_vm12  ;;  %vm1206_vm5 = vweird.f32 %v1200_v24 }
 0x1f1   :  { %v1164_v35 = vsub.f32 1.0, %v1163_v16  ;;  %vm1188_vm1 = vmor %vm1186_vm15, %vm1187_vm13 }
 0x1f2   :  { %v1183_v11 = vsub.f32 1.0, %v1182_v45 }
 0x1f3   :  { %v1165_v33 = vmul.f32 %v2591_v47, %v1164_v35 }
 0x1f4   :  { %v1184_v18 = vmul.f32 %v2593_v61, %v1183_v11 }
 0x1f5   :  { %v2595_v52 = vpop.eup %2594  ;;  %v1166_v60 = vadd.f32 %v2591_v47, %v1165_v33  ;;  %v1213_v33 = vor.u32 1.1754944e-38, %v1212_v0 }
 0x1f6   :  { %v1185_v6 = vadd.f32 %v2593_v61, %v1184_v18  ;;  %v1202_v36 = vmul.f32 %v2595_v52, %v1200_v24  ;;  %v2597_v49 = vpop.eup %2596  ;;  %vm1207_vm4 = vweird.f32 %v2595_v52 }
 0x1f7   :  { %v1170_v53 = vsel %vm1169_vm0, %v2591_v47, %v1166_v60  ;;  %v1210_v47 = vand.u32 2147483647, %v1200_v24  ;;  %vm1208_vm6 = vmor %vm1206_vm5, %vm1207_vm4  ;;  %v1224_v24 = vunpack.c.h.bf16 %v3049_v48 }
 0x1f8   :  { %v1175_v41 = vsel %vm1172_vm2, %v1174_v26, %v1170_v53  ;;  %v1189_v50 = vsel %vm1188_vm1, %v2593_v61, %v1185_v6  ;;  %v1203_v7 = vsub.f32 1.0, %v1202_v36  ;;  %v1226_v53 = vunpack.c.h.bf16 %v3091_v19 }
 0x1f9   :  { %v1194_v16 = vsel %vm1191_vm3, %v1193_v29, %v1189_v50  ;;  %v1217_v45 = vmul.f32 %v2597_v49, %v1175_v41  ;;  %vm1211_vm7 = vcmp.eq.f32.partialorder %v1210_v47, 8.507059e+37 }
 0x1fa   :  { %v1216_v35 = vmul.f32 %v1194_v16, %v3110_v39  ;;  %v1204_v11 = vmul.f32 %v2595_v52, %v1203_v7  ;;  %v1223_v39 = vunpack.c.l.bf16 %v3049_v48 }
 0x1fc   :  { %v3150_v62 = vadd.f32 %v1217_v45, %v1216_v35  ;;  %v1205_v1 = vadd.f32 %v2595_v52, %v1204_v11 }
 0x1fe   :  { %2598 = vtanh.f32 %v3150_v62  ;;  %v1209_v22 = vsel %vm1208_vm6, %v2595_v52, %v1205_v1 }
 0x1ff   :  { %v1214_v12 = vsel %vm1211_vm7, %v1213_v33, %v1209_v22  ;;  %v1225_v33 = vunpack.c.l.bf16 %v3091_v19 }
 0x204   :  { %v2599_v61 = vpop.eup %2598 }
 0x205   :  { %v1220_v18 = vmul.f32 %v2599_v61, %v1214_v12 }
 0x207   :  { %v1227_v25 = vpack.c.bf16 %v1220_v18, %v1220_v18 }
 0x209   :  { %1236 = vmatmul.bf16.vlgmr.msra.gmra.mxu0 %v1227_v25  ;;  %1249 = vmatmul.bf16.vlgmr.msra.gmra.mxu1 %v1227_v25 }
 0x20a   :  { %1262 = vmatmul.bf16.vlgmr.msra.gmra.mxu2 %v1227_v25  ;;  %1275 = vmatmul.bf16.vlgmr.msra.gmra.mxu3 %v1227_v25 }
 0x20b   :  { %1480 = vmatpush.bf16.msra.mxu0 %v2852_v23  ;;  %1493 = vmatpush.bf16.msra.mxu1 %v2854_v27 }
 0x20c   :  { %1506 = vmatpush.bf16.msra.mxu2 %v2867_v42  ;;  %1519 = vmatpush.bf16.msra.mxu3 %v2856_v28 }
 0x20f   :  { %1481 = vmatpush.bf16.msra.mxu0 %v2859_v32  ;;  %1494 = vmatpush.bf16.msra.mxu1 %v2863_v37 }
 0x210   :  { %1507 = vmatpush.bf16.msra.mxu2 %v2888_v63  ;;  %1520 = vmatpush.bf16.msra.mxu3 %v2865_v38 }
 0x213   :  { %1482 = vmatpush.bf16.msra.mxu0 %v2881_v54  ;;  %1495 = vmatpush.bf16.msra.mxu1 %v2883_v58 }
 0x214   :  { %1508 = vmatpush.bf16.msra.mxu2 %v2899_v10  ;;  %1521 = vmatpush.bf16.msra.mxu3 %v2885_v59 }
 0x217   :  { %1483 = vmatpush.bf16.msra.mxu0 %v2892_v3  ;;  %1496 = vmatpush.bf16.msra.mxu1 %v2894_v4 }
 0x218   :  { %1509 = vmatpush.bf16.msra.mxu2 %v2916_v44  ;;  %1522 = vmatpush.bf16.msra.mxu3 %v2897_v8 }
 0x21b   :  { %1484 = vmatpush.bf16.msra.mxu0 %v2909_v14  ;;  %1497 = vmatpush.bf16.msra.mxu1 %v2911_v20 }
 0x21c   :  { %1510 = vmatpush.bf16.msra.mxu2 %v2927_v43  ;;  %1523 = vmatpush.bf16.msra.mxu3 %v2913_v21 }
 0x21f   :  { %1485 = vmatpush.bf16.msra.mxu0 %v2920_v30  ;;  %1498 = vmatpush.bf16.msra.mxu1 %v2922_v31 }
 0x220   :  { %1511 = vmatpush.bf16.msra.mxu2 %v2941_v57  ;;  %1524 = vmatpush.bf16.msra.mxu3 %v2925_v40 }
 0x223   :  { %1486 = vmatpush.bf16.msra.mxu0 %v2937_v51  ;;  %1499 = vmatpush.bf16.msra.mxu1 %v2939_v56 }
 0x224   :  { %1512 = vmatpush.bf16.msra.mxu2 %v2953_v9  ;;  %1525 = vmatpush.bf16.msra.mxu3 %v2944_v34 }
 0x227   :  { %1487 = vmatpush.bf16.msra.mxu0 %v2948_v2  ;;  %1500 = vmatpush.bf16.msra.mxu1 %v2950_v5 }
 0x228   :  { %1513 = vmatpush.bf16.msra.mxu2 %v2960_v15  ;;  %1526 = vmatpush.bf16.msra.mxu3 %v2962_v17 }
 0x286   :  { %v1237_v52 = vpop.f32.mrf.mxu0  ;;  %v1250_v60 = vpop.f32.mrf.mxu1 }
 0x287   :  { %v1280_v26 = vadd.f32 %v1237_v52, %v1223_v39  ;;  %v1281_v6 = vadd.f32 %v1250_v60, %v1224_v24 }
 0x289   :  { %v2436_v36 = vmul.f32 -1.442695, %v1280_v26  ;;  %v2437_v29 = vmul.f32 -1.442695, %v1281_v6 }
 0x28b   :  { %2600 = vpow2.f32 %v2436_v36 }
 0x28c   :  { %2602 = vpow2.f32 %v2437_v29 }
 0x28d   :  { %v1263_v49 = vpop.f32.mrf.mxu2  ;;  %v1276_v41 = vpop.f32.mrf.mxu3 }
 0x28e   :  { %v1283_v50 = vadd.f32 %v1276_v41, %v1226_v53  ;;  %v1239_v7 = vpop.f32.mrf.mxu0  ;;  %v1252_v16 = vpop.f32.mrf.mxu1  ;;  %v1282_v18 = vadd.f32 %v1263_v49, %v1225_v33 }
 0x290   :  { %v2438_v45 = vmul.f32 -1.442695, %v1283_v50 }
 0x291   :  { %v2601_v35 = vpop.eup %2600 }
 0x292   :  { %v2603_v11 = vpop.eup %2602  ;;  %v1287_v1 = vadd.f32 1.0, %v2601_v35  ;;  %2604 = vpow2.f32 %v2438_v45 }
 0x293   :  { %v1306_v48 = vadd.f32 1.0, %v2603_v11 }
 0x294   :  { %2606 = vrcp.f32 %v1287_v1  ;;  %v1299_v26 = vand.u32 2147483648, %v1287_v1  ;;  %v1297_v29 = vand.u32 2147483647, %v1287_v1  ;;  %vm1293_vm10 = vweird.f32 %v1287_v1 }
 0x295   :  { %2608 = vrcp.f32 %v1306_v48  ;;  %v1265_v0 = vpop.f32.mrf.mxu2  ;;  %v1278_v47 = vpop.f32.mrf.mxu3  ;;  %v1318_v6 = vand.u32 2147483648, %v1306_v48  ;;  %v1316_v41 = vand.u32 2147483647, %v1306_v48  ;;  %vm1312_vm11 = vweird.f32 %v1306_v48 }
 0x296   :  { %v1300_v49 = vor.u32 1.1754944e-38, %v1299_v26  ;;  %vm1298_vm14 = vcmp.eq.f32.partialorder %v1297_v29, 8.507059e+37 }
 0x297   :  { %v1319_v45 = vor.u32 1.1754944e-38, %v1318_v6  ;;  %vm1317_vm15 = vcmp.eq.f32.partialorder %v1316_v41, 8.507059e+37 }
 0x298   :  { %v2605_v22 = vpop.eup %2604 }
 0x299   :  { %v1326_v61 = vadd.f32 1.0, %v2605_v22 }
 0x29a   :  { %v2607_v12 = vpop.eup %2606 }
 0x29b   :  { %v2609_v25 = vpop.eup %2608  ;;  %v1289_v39 = vmul.f32 %v2607_v12, %v1287_v1  ;;  %2610 = vrcp.f32 %v1326_v61  ;;  %vm1294_vm8 = vweird.f32 %v2607_v12  ;;  %vm1332_vm1 = vweird.f32 %v1326_v61 }
 0x29c   :  { %v1308_v24 = vmul.f32 %v2609_v25, %v1306_v48  ;;  %2612 = vtanh.f32 %v1282_v18  ;;  %vm1313_vm9 = vweird.f32 %v2609_v25  ;;  %vm1295_vm12 = vmor %vm1293_vm10, %vm1294_vm8 }
 0x29d   :  { %v1290_v52 = vsub.f32 1.0, %v1289_v39  ;;  %vm1314_vm13 = vmor %vm1312_vm11, %vm1313_vm9 }
 0x29e   :  { %v1309_v60 = vsub.f32 1.0, %v1308_v24 }
 0x29f   :  { %v1291_v36 = vmul.f32 %v2607_v12, %v1290_v52  ;;  %v1338_v52 = vand.u32 2147483648, %v1326_v61 }
 0x2a0   :  { %v1310_v53 = vmul.f32 %v2609_v25, %v1309_v60 }
 0x2a1   :  { %v2611_v50 = vpop.eup %2610  ;;  %v1292_v19 = vadd.f32 %v2607_v12, %v1291_v36  ;;  %v1339_v26 = vor.u32 1.1754944e-38, %v1338_v52 }
 0x2a2   :  { %v1311_v7 = vadd.f32 %v2609_v25, %v1310_v53  ;;  %v1328_v16 = vmul.f32 %v2611_v50, %v1326_v61  ;;  %v2613_v11 = vpop.eup %2612  ;;  %vm1333_vm0 = vweird.f32 %v2611_v50 }
 0x2a3   :  { %v1296_v35 = vsel %vm1295_vm12, %v2607_v12, %v1292_v19  ;;  %v1336_v12 = vand.u32 2147483647, %v1326_v61  ;;  %vm1334_vm2 = vmor %vm1332_vm1, %vm1333_vm0  ;;  %v1350_v61 = vunpack.c.h.bf16 %v3062_v46 }
 0x2a4   :  { %v1301_v0 = vsel %vm1298_vm14, %v1300_v49, %v1296_v35  ;;  %v1315_v47 = vsel %vm1314_vm13, %v2609_v25, %v1311_v7  ;;  %v1329_v22 = vsub.f32 1.0, %v1328_v16  ;;  %v3356_v16 = vld [vmem:[#allocation15_spill] sm:$0xff] }
 0x2a5   :  { %v1320_v33 = vsel %vm1317_vm15, %v1319_v45, %v1315_v47  ;;  %v1343_v18 = vmul.f32 %v2613_v11, %v1301_v0  ;;  %vm1337_vm3 = vcmp.eq.f32.partialorder %v1336_v12, 8.507059e+37  ;;  %v1352_v45 = vunpack.c.h.bf16 %v3356_v16 }
 0x2a6   :  { %v1342_v39 = vmul.f32 %v1320_v33, %v3150_v62  ;;  %v1330_v24 = vmul.f32 %v2611_v50, %v1329_v22  ;;  %v1349_v62 = vunpack.c.l.bf16 %v3062_v46 }
 0x2a8   :  { %v3190_v1 = vadd.f32 %v1343_v18, %v1342_v39  ;;  %v1331_v48 = vadd.f32 %v2611_v50, %v1330_v24 }
 0x2aa   :  { %2614 = vtanh.f32 %v3190_v1  ;;  %v1335_v60 = vsel %vm1334_vm2, %v2611_v50, %v1331_v48 }
 0x2ab   :  { %v1340_v6 = vsel %vm1337_vm3, %v1339_v26, %v1335_v60  ;;  %v1351_v60 = vunpack.c.l.bf16 %v3356_v16 }
 0x2b0   :  { %v2615_v25 = vpop.eup %2614 }
 0x2b1   :  { %v1346_v36 = vmul.f32 %v2615_v25, %v1340_v6 }
 0x2b3   :  { %v1353_v29 = vpack.c.bf16 %v1346_v36, %v1346_v36 }
 0x2b5   :  { %1362 = vmatmul.bf16.vlgmr.msrb.gmra.mxu0 %v1353_v29  ;;  %1375 = vmatmul.bf16.vlgmr.msrb.gmra.mxu1 %v1353_v29 }
 0x2b6   :  { %1388 = vmatmul.bf16.vlgmr.msrb.gmra.mxu2 %v1353_v29  ;;  %1401 = vmatmul.bf16.vlgmr.msrb.gmra.mxu3 %v1353_v29 }
 0x2b7   :  { %1606 = vmatpush.bf16.msrb.mxu0 %v2852_v23  ;;  %1619 = vmatpush.bf16.msrb.mxu1 %v2854_v27 }
 0x2b8   :  { %1632 = vmatpush.bf16.msrb.mxu2 %v2867_v42  ;;  %1645 = vmatpush.bf16.msrb.mxu3 %v2856_v28 }
 0x2bb   :  { %1607 = vmatpush.bf16.msrb.mxu0 %v2859_v32  ;;  %1620 = vmatpush.bf16.msrb.mxu1 %v2863_v37 }
 0x2bc   :  { %1633 = vmatpush.bf16.msrb.mxu2 %v2888_v63  ;;  %1646 = vmatpush.bf16.msrb.mxu3 %v2865_v38 }
 0x2bf   :  { %1608 = vmatpush.bf16.msrb.mxu0 %v2881_v54  ;;  %1621 = vmatpush.bf16.msrb.mxu1 %v2883_v58 }
 0x2c0   :  { %1634 = vmatpush.bf16.msrb.mxu2 %v2899_v10  ;;  %1647 = vmatpush.bf16.msrb.mxu3 %v2885_v59 }
 0x2c3   :  { %1609 = vmatpush.bf16.msrb.mxu0 %v2892_v3  ;;  %1622 = vmatpush.bf16.msrb.mxu1 %v2894_v4 }
 0x2c4   :  { %1635 = vmatpush.bf16.msrb.mxu2 %v2916_v44  ;;  %1648 = vmatpush.bf16.msrb.mxu3 %v2897_v8 }
 0x2c7   :  { %1610 = vmatpush.bf16.msrb.mxu0 %v2909_v14  ;;  %1623 = vmatpush.bf16.msrb.mxu1 %v2911_v20 }
 0x2c8   :  { %1636 = vmatpush.bf16.msrb.mxu2 %v2927_v43  ;;  %1649 = vmatpush.bf16.msrb.mxu3 %v2913_v21 }
 0x2cb   :  { %1611 = vmatpush.bf16.msrb.mxu0 %v2920_v30  ;;  %1624 = vmatpush.bf16.msrb.mxu1 %v2922_v31 }
 0x2cc   :  { %1637 = vmatpush.bf16.msrb.mxu2 %v2941_v57  ;;  %1650 = vmatpush.bf16.msrb.mxu3 %v2925_v40 }
 0x2cf   :  { %1612 = vmatpush.bf16.msrb.mxu0 %v2937_v51  ;;  %1625 = vmatpush.bf16.msrb.mxu1 %v2939_v56 }
 0x2d0   :  { %1638 = vmatpush.bf16.msrb.mxu2 %v2953_v9  ;;  %1651 = vmatpush.bf16.msrb.mxu3 %v2944_v34 }
 0x2d3   :  { %1613 = vmatpush.bf16.msrb.mxu0 %v2948_v2  ;;  %1626 = vmatpush.bf16.msrb.mxu1 %v2950_v5 }
 0x2d4   :  { %1639 = vmatpush.bf16.msrb.mxu2 %v2960_v15  ;;  %1652 = vmatpush.bf16.msrb.mxu3 %v2962_v17 }
 0x332   :  { %v1363_v53 = vpop.f32.mrf.mxu0  ;;  %v1376_v41 = vpop.f32.mrf.mxu1 }
 0x333   :  { %v1406_v50 = vadd.f32 %v1363_v53, %v1349_v62  ;;  %v1407_v19 = vadd.f32 %v1376_v41, %v1350_v61 }
 0x335   :  { %v2439_v49 = vmul.f32 -1.442695, %v1406_v50  ;;  %v2440_v7 = vmul.f32 -1.442695, %v1407_v19 }
 0x337   :  { %2616 = vpow2.f32 %v2439_v49 }
 0x338   :  { %2618 = vpow2.f32 %v2440_v7 }
 0x339   :  { %v1389_v35 = vpop.f32.mrf.mxu2  ;;  %v1402_v11 = vpop.f32.mrf.mxu3 }
 0x33a   :  { %v1409_v0 = vadd.f32 %v1402_v11, %v1352_v45  ;;  %v1365_v47 = vpop.f32.mrf.mxu0  ;;  %v1378_v22 = vpop.f32.mrf.mxu1  ;;  %v1408_v6 = vadd.f32 %v1389_v35, %v1351_v60 }
 0x33c   :  { %v2441_v33 = vmul.f32 -1.442695, %v1409_v0 }
 0x33d   :  { %v2617_v18 = vpop.eup %2616 }
 0x33e   :  { %v2619_v39 = vpop.eup %2618  ;;  %v1413_v24 = vadd.f32 1.0, %v2617_v18  ;;  %2620 = vpow2.f32 %v2441_v33 }
 0x33f   :  { %v1432_v46 = vadd.f32 1.0, %v2619_v39 }
 0x340   :  { %2622 = vrcp.f32 %v1413_v24  ;;  %v1425_v41 = vand.u32 2147483648, %v1413_v24  ;;  %v1423_v49 = vand.u32 2147483647, %v1413_v24  ;;  %vm1419_vm6 = vweird.f32 %v1413_v24 }
 0x341   :  { %2624 = vrcp.f32 %v1432_v46  ;;  %v1391_v48 = vpop.f32.mrf.mxu2  ;;  %v1404_v52 = vpop.f32.mrf.mxu3  ;;  %v1444_v50 = vand.u32 2147483648, %v1432_v46  ;;  %v1442_v45 = vand.u32 2147483647, %v1432_v46  ;;  %vm1438_vm7 = vweird.f32 %v1432_v46 }
 0x342   :  { %v1426_v35 = vor.u32 1.1754944e-38, %v1425_v41  ;;  %vm1424_vm10 = vcmp.eq.f32.partialorder %v1423_v49, 8.507059e+37 }
 0x343   :  { %v1445_v22 = vor.u32 1.1754944e-38, %v1444_v50  ;;  %vm1443_vm11 = vcmp.eq.f32.partialorder %v1442_v45, 8.507059e+37 }
 0x344   :  { %v2621_v12 = vpop.eup %2620 }
 0x345   :  { %v1452_v26 = vadd.f32 1.0, %v2621_v12 }
 0x346   :  { %v2623_v25 = vpop.eup %2622 }
 0x347   :  { %v2625_v36 = vpop.eup %2624  ;;  %v1415_v29 = vmul.f32 %v2623_v25, %v1413_v24  ;;  %2626 = vrcp.f32 %v1452_v26  ;;  %vm1420_vm4 = vweird.f32 %v2623_v25  ;;  %vm1458_vm13 = vweird.f32 %v1452_v26 }
 0x348   :  { %v1434_v62 = vmul.f32 %v2625_v36, %v1432_v46  ;;  %2628 = vtanh.f32 %v1408_v6  ;;  %vm1439_vm5 = vweird.f32 %v2625_v36  ;;  %vm1421_vm8 = vmor %vm1419_vm6, %vm1420_vm4 }
 0x349   :  { %v1416_v61 = vsub.f32 1.0, %v1415_v29  ;;  %vm1440_vm9 = vmor %vm1438_vm7, %vm1439_vm5 }
 0x34a   :  { %v1435_v53 = vsub.f32 1.0, %v1434_v62  ;;  %v1464_v62 = vand.u32 2147483648, %v1452_v26 }
 0x34b   :  { %v1417_v19 = vmul.f32 %v2623_v25, %v1416_v61 }
 0x34c   :  { %v1436_v7 = vmul.f32 %v2625_v36, %v1435_v53  ;;  %v1465_v53 = vor.u32 1.1754944e-38, %v1464_v62 }
 0x34d   :  { %v2627_v11 = vpop.eup %2626  ;;  %v1418_v16 = vadd.f32 %v2623_v25, %v1417_v19 }
 0x34e   :  { %v1437_v0 = vadd.f32 %v2625_v36, %v1436_v7  ;;  %v1454_v47 = vmul.f32 %v2627_v11, %v1452_v26  ;;  %v2629_v18 = vpop.eup %2628  ;;  %vm1459_vm12 = vweird.f32 %v2627_v11 }
 0x34f   :  { %v1422_v33 = vsel %vm1421_vm8, %v2623_v25, %v1418_v16  ;;  %v1462_v25 = vand.u32 2147483647, %v1452_v26  ;;  %vm1460_vm14 = vmor %vm1458_vm13, %vm1459_vm12 }
 0x350   :  { %v1427_v39 = vsel %vm1424_vm10, %v1426_v35, %v1422_v33  ;;  %v1441_v48 = vsel %vm1440_vm9, %v2625_v36, %v1437_v0  ;;  %v1455_v52 = vsub.f32 1.0, %v1454_v47  ;;  %v3358_v47 = vld [vmem:[#allocation16_spill] sm:$0xff] }
 0x351   :  { %v1446_v12 = vsel %vm1443_vm11, %v1445_v22, %v1441_v48  ;;  %v1469_v60 = vmul.f32 %v2629_v18, %v1427_v39  ;;  %vm1463_vm15 = vcmp.eq.f32.partialorder %v1462_v25, 8.507059e+37  ;;  %v1478_v22 = vunpack.c.h.bf16 %v3358_v47 }
 0x352   :  { %v1468_v6 = vmul.f32 %v1446_v12, %v3190_v1  ;;  %v1456_v29 = vmul.f32 %v2627_v11, %v1455_v52  ;;  %v3357_v1 = vld [vmem:[#allocation11_spill] sm:$0xff] }
 0x353   :  { %v1475_v26 = vunpack.c.l.bf16 %v3357_v1  ;;  %v1476_v49 = vunpack.c.h.bf16 %v3357_v1 }
 0x354   :  { %v3230_v24 = vadd.f32 %v1469_v60, %v1468_v6  ;;  %v1457_v46 = vadd.f32 %v2627_v11, %v1456_v29 }
 0x356   :  { %2630 = vtanh.f32 %v3230_v24  ;;  %v1461_v61 = vsel %vm1460_vm14, %v2627_v11, %v1457_v46 }
 0x357   :  { %v1466_v41 = vsel %vm1463_vm15, %v1465_v53, %v1461_v61  ;;  %v1477_v53 = vunpack.c.l.bf16 %v3358_v47 }
 0x35c   :  { %v2631_v36 = vpop.eup %2630 }
 0x35d   :  { %v1472_v50 = vmul.f32 %v2631_v36, %v1466_v41 }
 0x35f   :  { %v1479_v19 = vpack.c.bf16 %v1472_v50, %v1472_v50 }
 0x361   :  { %1488 = vmatmul.bf16.vlgmr.msra.gmra.mxu0 %v1479_v19  ;;  %1501 = vmatmul.bf16.vlgmr.msra.gmra.mxu1 %v1479_v19 }
 0x362   :  { %1514 = vmatmul.bf16.vlgmr.msra.gmra.mxu2 %v1479_v19  ;;  %1527 = vmatmul.bf16.vlgmr.msra.gmra.mxu3 %v1479_v19 }
 0x363   :  { %1732 = vmatpush.bf16.msra.mxu0 %v2852_v23  ;;  %1745 = vmatpush.bf16.msra.mxu1 %v2854_v27 }
 0x364   :  { %1758 = vmatpush.bf16.msra.mxu2 %v2867_v42  ;;  %1771 = vmatpush.bf16.msra.mxu3 %v2856_v28 }
 0x367   :  { %1733 = vmatpush.bf16.msra.mxu0 %v2859_v32  ;;  %1746 = vmatpush.bf16.msra.mxu1 %v2863_v37 }
 0x368   :  { %1759 = vmatpush.bf16.msra.mxu2 %v2888_v63  ;;  %1772 = vmatpush.bf16.msra.mxu3 %v2865_v38 }
 0x36b   :  { %1734 = vmatpush.bf16.msra.mxu0 %v2881_v54  ;;  %1747 = vmatpush.bf16.msra.mxu1 %v2883_v58 }
 0x36c   :  { %1760 = vmatpush.bf16.msra.mxu2 %v2899_v10  ;;  %1773 = vmatpush.bf16.msra.mxu3 %v2885_v59 }
 0x36f   :  { %1735 = vmatpush.bf16.msra.mxu0 %v2892_v3  ;;  %1748 = vmatpush.bf16.msra.mxu1 %v2894_v4 }
 0x370   :  { %1761 = vmatpush.bf16.msra.mxu2 %v2916_v44  ;;  %1774 = vmatpush.bf16.msra.mxu3 %v2897_v8 }
 0x373   :  { %1736 = vmatpush.bf16.msra.mxu0 %v2909_v14  ;;  %1749 = vmatpush.bf16.msra.mxu1 %v2911_v20 }
 0x374   :  { %1762 = vmatpush.bf16.msra.mxu2 %v2927_v43  ;;  %1775 = vmatpush.bf16.msra.mxu3 %v2913_v21 }
 0x377   :  { %1737 = vmatpush.bf16.msra.mxu0 %v2920_v30  ;;  %1750 = vmatpush.bf16.msra.mxu1 %v2922_v31 }
 0x378   :  { %1763 = vmatpush.bf16.msra.mxu2 %v2941_v57  ;;  %1776 = vmatpush.bf16.msra.mxu3 %v2925_v40 }
 0x37b   :  { %1738 = vmatpush.bf16.msra.mxu0 %v2937_v51  ;;  %1751 = vmatpush.bf16.msra.mxu1 %v2939_v56 }
 0x37c   :  { %1764 = vmatpush.bf16.msra.mxu2 %v2953_v9  ;;  %1777 = vmatpush.bf16.msra.mxu3 %v2944_v34 }
 0x37f   :  { %1739 = vmatpush.bf16.msra.mxu0 %v2948_v2  ;;  %1752 = vmatpush.bf16.msra.mxu1 %v2950_v5 }
 0x380   :  { %1765 = vmatpush.bf16.msra.mxu2 %v2960_v15  ;;  %1778 = vmatpush.bf16.msra.mxu3 %v2962_v17 }
 0x3de   :  { %v1489_v7 = vpop.f32.mrf.mxu0  ;;  %v1502_v45 = vpop.f32.mrf.mxu1 }
 0x3df   :  { %v1532_v11 = vadd.f32 %v1489_v7, %v1475_v26  ;;  %v1533_v16 = vadd.f32 %v1502_v45, %v1476_v49 }
 0x3e1   :  { %v2442_v35 = vmul.f32 -1.442695, %v1532_v11  ;;  %v2443_v0 = vmul.f32 -1.442695, %v1533_v16 }
 0x3e3   :  { %2632 = vpow2.f32 %v2442_v35 }
 0x3e4   :  { %2634 = vpow2.f32 %v2443_v0 }
 0x3e5   :  { %v1515_v33 = vpop.f32.mrf.mxu2  ;;  %v1528_v18 = vpop.f32.mrf.mxu3 }
 0x3e6   :  { %v1535_v39 = vadd.f32 %v1528_v18, %v1478_v22  ;;  %v1491_v48 = vpop.f32.mrf.mxu0  ;;  %v1504_v52 = vpop.f32.mrf.mxu1  ;;  %v1534_v50 = vadd.f32 %v1515_v33, %v1477_v53 }
 0x3e8   :  { %v2444_v12 = vmul.f32 -1.442695, %v1535_v39 }
 0x3e9   :  { %v2633_v60 = vpop.eup %2632 }
 0x3ea   :  { %v2635_v6 = vpop.eup %2634  ;;  %v1539_v29 = vadd.f32 1.0, %v2633_v60  ;;  %2636 = vpow2.f32 %v2444_v12 }
 0x3eb   :  { %v1558_v46 = vadd.f32 1.0, %v2635_v6 }
 0x3ec   :  { %2638 = vrcp.f32 %v1539_v29  ;;  %v1551_v45 = vand.u32 2147483648, %v1539_v29  ;;  %v1549_v35 = vand.u32 2147483647, %v1539_v29  ;;  %vm1545_vm2 = vweird.f32 %v1539_v29 }
 0x3ed   :  { %2640 = vrcp.f32 %v1558_v46  ;;  %v1517_v62 = vpop.f32.mrf.mxu2  ;;  %v1530_v25 = vpop.f32.mrf.mxu3  ;;  %v1570_v11 = vand.u32 2147483648, %v1558_v46  ;;  %v1568_v22 = vand.u32 2147483647, %v1558_v46  ;;  %vm1564_vm3 = vweird.f32 %v1558_v46 }
 0x3ee   :  { %v1552_v33 = vor.u32 1.1754944e-38, %v1551_v45  ;;  %vm1550_vm6 = vcmp.eq.f32.partialorder %v1549_v35, 8.507059e+37 }
 0x3ef   :  { %v1571_v52 = vor.u32 1.1754944e-38, %v1570_v11  ;;  %vm1569_vm7 = vcmp.eq.f32.partialorder %v1568_v22, 8.507059e+37 }
 0x3f0   :  { %v2637_v61 = vpop.eup %2636 }
 0x3f1   :  { %v1578_v36 = vadd.f32 1.0, %v2637_v61 }
 0x3f2   :  { %v2639_v41 = vpop.eup %2638 }
 0x3f3   :  { %v2641_v19 = vpop.eup %2640  ;;  %v1541_v1 = vmul.f32 %v2639_v41, %v1539_v29  ;;  %2642 = vrcp.f32 %v1578_v36  ;;  %vm1546_vm0 = vweird.f32 %v2639_v41  ;;  %vm1584_vm9 = vweird.f32 %v1578_v36 }
 0x3f4   :  { %v1560_v26 = vmul.f32 %v2641_v19, %v1558_v46  ;;  %2644 = vtanh.f32 %v1534_v50  ;;  %vm1565_vm1 = vweird.f32 %v2641_v19  ;;  %vm1547_vm4 = vmor %vm1545_vm2, %vm1546_vm0 }
 0x3f5   :  { %v1542_v49 = vsub.f32 1.0, %v1541_v1  ;;  %vm1566_vm5 = vmor %vm1564_vm3, %vm1565_vm1 }
 0x3f6   :  { %v1561_v7 = vsub.f32 1.0, %v1560_v26  ;;  %v1590_v26 = vand.u32 2147483648, %v1578_v36 }
 0x3f7   :  { %v1543_v16 = vmul.f32 %v2639_v41, %v1542_v49 }
 0x3f8   :  { %v1562_v0 = vmul.f32 %v2641_v19, %v1561_v7  ;;  %v1591_v7 = vor.u32 1.1754944e-38, %v1590_v26 }
 0x3f9   :  { %v2643_v18 = vpop.eup %2642  ;;  %v1544_v47 = vadd.f32 %v2639_v41, %v1543_v16 }
 0x3fa   :  { %v1563_v39 = vadd.f32 %v2641_v19, %v1562_v0  ;;  %v1580_v48 = vmul.f32 %v2643_v18, %v1578_v36  ;;  %v2645_v60 = vpop.eup %2644  ;;  %vm1585_vm8 = vweird.f32 %v2643_v18 }
 0x3fb   :  { %v1548_v12 = vsel %vm1547_vm4, %v2639_v41, %v1544_v47  ;;  %v1588_v41 = vand.u32 2147483647, %v1578_v36  ;;  %vm1586_vm10 = vmor %vm1584_vm9, %vm1585_vm8 }
 0x3fc   :  { %v1553_v6 = vsel %vm1550_vm6, %v1552_v33, %v1548_v12  ;;  %v1567_v62 = vsel %vm1566_vm5, %v2641_v19, %v1563_v39  ;;  %v1581_v25 = vsub.f32 1.0, %v1580_v48 }
 0x3fd   :  { %v1572_v61 = vsel %vm1569_vm7, %v1571_v52, %v1567_v62  ;;  %v1595_v53 = vmul.f32 %v2645_v60, %v1553_v6  ;;  %vm1589_vm11 = vcmp.eq.f32.partialorder %v1588_v41, 8.507059e+37 }
 0x3fe   :  { %v1594_v50 = vmul.f32 %v1572_v61, %v3230_v24  ;;  %v1582_v1 = vmul.f32 %v2643_v18, %v1581_v25 }
 0x400   :  { %v3270_v29 = vadd.f32 %v1595_v53, %v1594_v50  ;;  %v1583_v46 = vadd.f32 %v2643_v18, %v1582_v1 }
 0x402   :  { %2646 = vtanh.f32 %v3270_v29  ;;  %v1587_v49 = vsel %vm1586_vm10, %v2643_v18, %v1583_v46 }
 0x403   :  { %v1592_v45 = vsel %vm1589_vm11, %v1591_v7, %v1587_v49 }
 0x408   :  { %v2647_v19 = vpop.eup %2646 }
 0x409   :  { %v1598_v11 = vmul.f32 %v2647_v19, %v1592_v45 }
 0x40b   :  { %v1605_v16 = vpack.c.bf16 %v1598_v11, %v1598_v11 }
 0x40d   :  { %1614 = vmatmul.bf16.vlgmr.msrb.gmra.mxu0 %v1605_v16  ;;  %1627 = vmatmul.bf16.vlgmr.msrb.gmra.mxu1 %v1605_v16 }
 0x40e   :  { %1640 = vmatmul.bf16.vlgmr.msrb.gmra.mxu2 %v1605_v16  ;;  %1653 = vmatmul.bf16.vlgmr.msrb.gmra.mxu3 %v1605_v16 }
 0x40f   :  { %1858 = vmatpush.bf16.msrb.mxu0 %v2852_v23  ;;  %1871 = vmatpush.bf16.msrb.mxu1 %v2854_v27  ;;  %v3359_v23 = vld [vmem:[#allocation12_spill] sm:$0xff] }
 0x410   :  { %1884 = vmatpush.bf16.msrb.mxu2 %v2867_v42  ;;  %1897 = vmatpush.bf16.msrb.mxu3 %v2856_v28  ;;  %v1601_v27 = vunpack.c.l.bf16 %v3359_v23  ;;  %v1602_v28 = vunpack.c.h.bf16 %v3359_v23 }
 0x413   :  { %1859 = vmatpush.bf16.msrb.mxu0 %v2859_v32  ;;  %1872 = vmatpush.bf16.msrb.mxu1 %v2863_v37 }
 0x414   :  { %1885 = vmatpush.bf16.msrb.mxu2 %v2888_v63  ;;  %1898 = vmatpush.bf16.msrb.mxu3 %v2865_v38 }
 0x417   :  { %1860 = vmatpush.bf16.msrb.mxu0 %v2881_v54  ;;  %1873 = vmatpush.bf16.msrb.mxu1 %v2883_v58 }
 0x418   :  { %1886 = vmatpush.bf16.msrb.mxu2 %v2899_v10  ;;  %1899 = vmatpush.bf16.msrb.mxu3 %v2885_v59  ;;  %v3360_v59 = vld [vmem:[#allocation17_spill] sm:$0xff] }
 0x419   :  { %v1604_v63 = vunpack.c.h.bf16 %v3360_v59 }
 0x41b   :  { %1861 = vmatpush.bf16.msrb.mxu0 %v2892_v3  ;;  %1874 = vmatpush.bf16.msrb.mxu1 %v2894_v4 }
 0x41c   :  { %1887 = vmatpush.bf16.msrb.mxu2 %v2916_v44  ;;  %1900 = vmatpush.bf16.msrb.mxu3 %v2897_v8 }
 0x41f   :  { %1862 = vmatpush.bf16.msrb.mxu0 %v2909_v14  ;;  %1875 = vmatpush.bf16.msrb.mxu1 %v2911_v20 }
 0x420   :  { %1888 = vmatpush.bf16.msrb.mxu2 %v2927_v43  ;;  %1901 = vmatpush.bf16.msrb.mxu3 %v2913_v21 }
 0x423   :  { %1863 = vmatpush.bf16.msrb.mxu0 %v2920_v30  ;;  %1876 = vmatpush.bf16.msrb.mxu1 %v2922_v31 }
 0x424   :  { %1889 = vmatpush.bf16.msrb.mxu2 %v2941_v57  ;;  %1902 = vmatpush.bf16.msrb.mxu3 %v2925_v40 }
 0x427   :  { %1864 = vmatpush.bf16.msrb.mxu0 %v2937_v51  ;;  %1877 = vmatpush.bf16.msrb.mxu1 %v2939_v56  ;;  %v1603_v56 = vunpack.c.l.bf16 %v3360_v59 }
 0x428   :  { %1890 = vmatpush.bf16.msrb.mxu2 %v2953_v9  ;;  %1903 = vmatpush.bf16.msrb.mxu3 %v2944_v34 }
 0x42b   :  { %1865 = vmatpush.bf16.msrb.mxu0 %v2948_v2  ;;  %1878 = vmatpush.bf16.msrb.mxu1 %v2950_v5 }
 0x42c   :  { %1891 = vmatpush.bf16.msrb.mxu2 %v2960_v15  ;;  %1904 = vmatpush.bf16.msrb.mxu3 %v2962_v17 }
 0x48a   :  { %v1615_v32 = vpop.f32.mrf.mxu0  ;;  %v1628_v37 = vpop.f32.mrf.mxu1 }
 0x48b   :  { %v1658_v38 = vadd.f32 %v1615_v32, %v1601_v27  ;;  %v1659_v42 = vadd.f32 %v1628_v37, %v1602_v28 }
 0x48d   :  { %v2445_v54 = vmul.f32 -1.442695, %v1658_v38  ;;  %v2446_v58 = vmul.f32 -1.442695, %v1659_v42 }
 0x48f   :  { %2648 = vpow2.f32 %v2445_v54 }
 0x490   :  { %2650 = vpow2.f32 %v2446_v58 }
 0x491   :  { %v1641_v3 = vpop.f32.mrf.mxu2  ;;  %v1654_v4 = vpop.f32.mrf.mxu3 }
 0x492   :  { %v1661_v8 = vadd.f32 %v1654_v4, %v1604_v63  ;;  %v1617_v10 = vpop.f32.mrf.mxu0  ;;  %v1630_v14 = vpop.f32.mrf.mxu1  ;;  %v1660_v2 = vadd.f32 %v1641_v3, %v1603_v56  ;;  %v1730_v3 = vunpack.c.h.bf16 %v3103_v55 }
 0x494   :  { %v2447_v20 = vmul.f32 -1.442695, %v1661_v8 }
 0x495   :  { %v2649_v21 = vpop.eup %2648 }
 0x496   :  { %v2651_v44 = vpop.eup %2650  ;;  %v1665_v30 = vadd.f32 1.0, %v2649_v21  ;;  %2652 = vpow2.f32 %v2447_v20 }
 0x497   :  { %v1684_v31 = vadd.f32 1.0, %v2651_v44 }
 0x498   :  { %2654 = vrcp.f32 %v1665_v30  ;;  %v1677_v36 = vand.u32 2147483648, %v1665_v30  ;;  %v1675_v22 = vand.u32 2147483647, %v1665_v30  ;;  %vm1671_vm14 = vweird.f32 %v1665_v30 }
 0x499   :  { %2656 = vrcp.f32 %v1684_v31  ;;  %v1643_v40 = vpop.f32.mrf.mxu2  ;;  %v1656_v43 = vpop.f32.mrf.mxu3  ;;  %v1696_v35 = vand.u32 2147483648, %v1684_v31  ;;  %v1694_v47 = vand.u32 2147483647, %v1684_v31  ;;  %vm1690_vm15 = vweird.f32 %v1684_v31 }
 0x49a   :  { %v1678_v48 = vor.u32 1.1754944e-38, %v1677_v36  ;;  %vm1676_vm2 = vcmp.eq.f32.partialorder %v1675_v22, 8.507059e+37 }
 0x49b   :  { %v1697_v60 = vor.u32 1.1754944e-38, %v1696_v35  ;;  %vm1695_vm3 = vcmp.eq.f32.partialorder %v1694_v47, 8.507059e+37 }
 0x49c   :  { %v2653_v51 = vpop.eup %2652 }
 0x49d   :  { %v1704_v57 = vadd.f32 1.0, %v2653_v51 }
 0x49e   :  { %v2655_v34 = vpop.eup %2654 }
 0x49f   :  { %v2657_v5 = vpop.eup %2656  ;;  %v1667_v9 = vmul.f32 %v2655_v34, %v1665_v30  ;;  %2658 = vrcp.f32 %v1704_v57  ;;  %vm1672_vm12 = vweird.f32 %v2655_v34  ;;  %v1716_v7 = vand.u32 2147483648, %v1704_v57 }
 0x4a0   :  { %v1686_v15 = vmul.f32 %v2657_v5, %v1684_v31  ;;  %2660 = vtanh.f32 %v1660_v2  ;;  %vm1691_vm13 = vweird.f32 %v2657_v5  ;;  %vm1673_vm0 = vmor %vm1671_vm14, %vm1672_vm12  ;;  %vm1710_vm5 = vweird.f32 %v1704_v57 }
 0x4a1   :  { %v1668_v17 = vsub.f32 1.0, %v1667_v9  ;;  %vm1692_vm1 = vmor %vm1690_vm15, %vm1691_vm13  ;;  %v1714_v19 = vand.u32 2147483647, %v1704_v57  ;;  %v1717_v11 = vor.u32 1.1754944e-38, %v1716_v7 }
 0x4a2   :  { %v1687_v24 = vsub.f32 1.0, %v1686_v15 }
 0x4a3   :  { %v1669_v0 = vmul.f32 %v2655_v34, %v1668_v17  ;;  %vm1715_vm7 = vcmp.eq.f32.partialorder %v1714_v19, 8.507059e+37 }
 0x4a4   :  { %v1688_v18 = vmul.f32 %v2657_v5, %v1687_v24 }
 0x4a5   :  { %v2659_v33 = vpop.eup %2658  ;;  %v1670_v39 = vadd.f32 %v2655_v34, %v1669_v0 }
 0x4a6   :  { %v1689_v52 = vadd.f32 %v2657_v5, %v1688_v18  ;;  %v1706_v12 = vmul.f32 %v2659_v33, %v1704_v57  ;;  %v2661_v62 = vpop.eup %2660  ;;  %vm1711_vm4 = vweird.f32 %v2659_v33  ;;  %v1729_v57 = vunpack.c.l.bf16 %v3103_v55 }
 0x4a7   :  { %v1674_v6 = vsel %vm1673_vm0, %v2655_v34, %v1670_v39  ;;  %vm1712_vm6 = vmor %vm1710_vm5, %vm1711_vm4 }
 0x4a8   :  { %v1679_v25 = vsel %vm1676_vm2, %v1678_v48, %v1674_v6  ;;  %v1693_v61 = vsel %vm1692_vm1, %v2657_v5, %v1689_v52  ;;  %v1707_v53 = vsub.f32 1.0, %v1706_v12 }
 0x4a9   :  { %v1698_v50 = vsel %vm1695_vm3, %v1697_v60, %v1693_v61  ;;  %v1721_v1 = vmul.f32 %v2661_v62, %v1679_v25 }
 0x4aa   :  { %v1720_v46 = vmul.f32 %v1698_v50, %v3270_v29  ;;  %v1708_v26 = vmul.f32 %v2659_v33, %v1707_v53  ;;  %v3361_v29 = vld [vmem:[#allocation13_spill] sm:$0xff] }
 0x4ab   :  { %v1727_v32 = vunpack.c.l.bf16 %v3361_v29  ;;  %v1728_v37 = vunpack.c.h.bf16 %v3361_v29 }
 0x4ac   :  { %v3310_v41 = vadd.f32 %v1721_v1, %v1720_v46  ;;  %v1709_v49 = vadd.f32 %v2659_v33, %v1708_v26 }
 0x4ae   :  { %2662 = vtanh.f32 %v3310_v41  ;;  %v1713_v45 = vsel %vm1712_vm6, %v2659_v33, %v1709_v49 }
 0x4af   :  { %v1718_v23 = vsel %vm1715_vm7, %v1717_v11, %v1713_v45 }
 0x4b4   :  { %v2663_v16 = vpop.eup %2662 }
 0x4b5   :  { %v1724_v27 = vmul.f32 %v2663_v16, %v1718_v23 }
 0x4b7   :  { %v1731_v28 = vpack.c.bf16 %v1724_v27, %v1724_v27 }
 0x4b9   :  { %1740 = vmatmul.bf16.vlgmr.msra.gmra.mxu0 %v1731_v28  ;;  %1753 = vmatmul.bf16.vlgmr.msra.gmra.mxu1 %v1731_v28 }
 0x4ba   :  { %1766 = vmatmul.bf16.vlgmr.msra.gmra.mxu2 %v1731_v28  ;;  %1779 = vmatmul.bf16.vlgmr.msra.gmra.mxu3 %v1731_v28 }
 0x536   :  { %v1741_v38 = vpop.f32.mrf.mxu0  ;;  %v1754_v42 = vpop.f32.mrf.mxu1 }
 0x537   :  { %v1784_v54 = vadd.f32 %v1741_v38, %v1727_v32  ;;  %v1785_v58 = vadd.f32 %v1754_v42, %v1728_v37 }
 0x539   :  { %v2448_v59 = vmul.f32 -1.442695, %v1784_v54  ;;  %v2449_v63 = vmul.f32 -1.442695, %v1785_v58 }
 0x53b   :  { %2664 = vpow2.f32 %v2448_v59 }
 0x53c   :  { %2666 = vpow2.f32 %v2449_v63 }
 0x53d   :  { %v1767_v4 = vpop.f32.mrf.mxu2  ;;  %v1780_v8 = vpop.f32.mrf.mxu3 }
 0x53e   :  { %v1787_v10 = vadd.f32 %v1780_v8, %v1730_v3  ;;  %v1743_v14 = vpop.f32.mrf.mxu0  ;;  %v1756_v20 = vpop.f32.mrf.mxu1  ;;  %v1786_v5 = vadd.f32 %v1767_v4, %v1729_v57  ;;  %v1856_v3 = vunpack.c.h.bf16 %v3108_v13  ;;  %v1855_v57 = vunpack.c.l.bf16 %v3108_v13 }
 0x540   :  { %v2450_v21 = vmul.f32 -1.442695, %v1787_v10 }
 0x541   :  { %v2665_v44 = vpop.eup %2664 }
 0x542   :  { %v2667_v30 = vpop.eup %2666  ;;  %v1791_v31 = vadd.f32 1.0, %v2665_v44  ;;  %2668 = vpow2.f32 %v2450_v21 }
 0x543   :  { %v1810_v40 = vadd.f32 1.0, %v2667_v30 }
 0x544   :  { %2670 = vrcp.f32 %v1791_v31  ;;  %v1803_v35 = vand.u32 2147483648, %v1791_v31  ;;  %v1801_v18 = vand.u32 2147483647, %v1791_v31  ;;  %vm1797_vm10 = vweird.f32 %v1791_v31 }
 0x545   :  { %2672 = vrcp.f32 %v1810_v40  ;;  %v1769_v43 = vpop.f32.mrf.mxu2  ;;  %v1782_v51 = vpop.f32.mrf.mxu3  ;;  %v1822_v0 = vand.u32 2147483648, %v1810_v40  ;;  %v1820_v33 = vand.u32 2147483647, %v1810_v40  ;;  %vm1816_vm11 = vweird.f32 %v1810_v40 }
 0x546   :  { %v1804_v48 = vor.u32 1.1754944e-38, %v1803_v35  ;;  %vm1802_vm14 = vcmp.eq.f32.partialorder %v1801_v18, 8.507059e+37 }
 0x547   :  { %v1823_v60 = vor.u32 1.1754944e-38, %v1822_v0  ;;  %vm1821_vm15 = vcmp.eq.f32.partialorder %v1820_v33, 8.507059e+37 }
 0x548   :  { %v2669_v56 = vpop.eup %2668 }
 0x549   :  { %v1830_v34 = vadd.f32 1.0, %v2669_v56 }
 0x54a   :  { %v2671_v2 = vpop.eup %2670 }
 0x54b   :  { %v2673_v9 = vpop.eup %2672  ;;  %v1793_v15 = vmul.f32 %v2671_v2, %v1791_v31  ;;  %2674 = vrcp.f32 %v1830_v34  ;;  %vm1798_vm8 = vweird.f32 %v2671_v2  ;;  %v1842_v19 = vand.u32 2147483648, %v1830_v34 }
 0x54c   :  { %v1812_v17 = vmul.f32 %v2673_v9, %v1810_v40  ;;  %2676 = vtanh.f32 %v1786_v5  ;;  %vm1817_vm9 = vweird.f32 %v2673_v9  ;;  %vm1799_vm12 = vmor %vm1797_vm10, %vm1798_vm8  ;;  %vm1836_vm1 = vweird.f32 %v1830_v34 }
 0x54d   :  { %v1794_v24 = vsub.f32 1.0, %v1793_v15  ;;  %vm1818_vm13 = vmor %vm1816_vm11, %vm1817_vm9  ;;  %v1840_v45 = vand.u32 2147483647, %v1830_v34  ;;  %v1843_v16 = vor.u32 1.1754944e-38, %v1842_v19 }
 0x54e   :  { %v1813_v36 = vsub.f32 1.0, %v1812_v17 }
 0x54f   :  { %v1795_v22 = vmul.f32 %v2671_v2, %v1794_v24  ;;  %vm1841_vm3 = vcmp.eq.f32.partialorder %v1840_v45, 8.507059e+37 }
 0x550   :  { %v1814_v47 = vmul.f32 %v2673_v9, %v1813_v36 }
 0x551   :  { %v2675_v39 = vpop.eup %2674  ;;  %v1796_v55 = vadd.f32 %v2671_v2, %v1795_v22 }
 0x552   :  { %v1815_v52 = vadd.f32 %v2673_v9, %v1814_v47  ;;  %v1832_v12 = vmul.f32 %v2675_v39, %v1830_v34  ;;  %v2677_v62 = vpop.eup %2676  ;;  %vm1837_vm0 = vweird.f32 %v2675_v39 }
 0x553   :  { %v1800_v6 = vsel %vm1799_vm12, %v2671_v2, %v1796_v55  ;;  %vm1838_vm2 = vmor %vm1836_vm1, %vm1837_vm0 }
 0x554   :  { %v1805_v25 = vsel %vm1802_vm14, %v1804_v48, %v1800_v6  ;;  %v1819_v61 = vsel %vm1818_vm13, %v2673_v9, %v1815_v52  ;;  %v1833_v53 = vsub.f32 1.0, %v1832_v12 }
 0x555   :  { %v1824_v50 = vsel %vm1821_vm15, %v1823_v60, %v1819_v61  ;;  %v1847_v1 = vmul.f32 %v2677_v62, %v1805_v25 }
 0x556   :  { %v1846_v46 = vmul.f32 %v1824_v50, %v3310_v41  ;;  %v1834_v26 = vmul.f32 %v2675_v39, %v1833_v53  ;;  %v3362_v41 = vld [vmem:[#allocation14_spill] sm:$0xff] }
 0x557   :  { %v1853_v32 = vunpack.c.l.bf16 %v3362_v41  ;;  %v1854_v37 = vunpack.c.h.bf16 %v3362_v41 }
 0x558   :  { %v3318_v49 = vadd.f32 %v1847_v1, %v1846_v46  ;;  %v1835_v7 = vadd.f32 %v2675_v39, %v1834_v26 }
 0x55a   :  { %2678 = vtanh.f32 %v3318_v49  ;;  %v1839_v11 = vsel %vm1838_vm2, %v2675_v39, %v1835_v7 }
 0x55b   :  { %v1844_v27 = vsel %vm1841_vm3, %v1843_v16, %v1839_v11  ;;  %vm2006_vm3 = vcmask 7168  }
 0x560   :  { %v2679_v23 = vpop.eup %2678 }
 0x561   :  { %v1850_v28 = vmul.f32 %v2679_v23, %v1844_v27  ;;  %v2567_v23 = vld [vmem:[%s3339_s4] ss:$0 sm:$0xff] }
 0x563   :  { %v1857_v29 = vpack.c.bf16 %v1850_v28, %v1850_v28 }
 0x565   :  { %1866 = vmatmul.bf16.vlgmr.msrb.gmra.mxu0 %v1857_v29  ;;  %1879 = vmatmul.bf16.vlgmr.msrb.gmra.mxu1 %v1857_v29 }
 0x566   :  { %1892 = vmatmul.bf16.vlgmr.msrb.gmra.mxu2 %v1857_v29  ;;  %1905 = vmatmul.bf16.vlgmr.msrb.gmra.mxu3 %v1857_v29 }
 0x5e2   :  { %v1867_v38 = vpop.f32.mrf.mxu0  ;;  %v1880_v42 = vpop.f32.mrf.mxu1 }
 0x5e3   :  { %v1910_v54 = vadd.f32 %v1867_v38, %v1853_v32  ;;  %v1911_v58 = vadd.f32 %v1880_v42, %v1854_v37 }
 0x5e5   :  { %v2451_v59 = vmul.f32 -1.442695, %v1910_v54  ;;  %v2452_v63 = vmul.f32 -1.442695, %v1911_v58 }
 0x5e7   :  { %2680 = vpow2.f32 %v2451_v59 }
 0x5e8   :  { %2682 = vpow2.f32 %v2452_v63 }
 0x5e9   :  { %v1893_v4 = vpop.f32.mrf.mxu2  ;;  %v1906_v8 = vpop.f32.mrf.mxu3 }
 0x5ea   :  { %v1913_v10 = vadd.f32 %v1906_v8, %v1856_v3  ;;  %v1869_v14 = vpop.f32.mrf.mxu0  ;;  %v1882_v20 = vpop.f32.mrf.mxu1  ;;  %v1912_v5 = vadd.f32 %v1893_v4, %v1855_v57 }
 0x5ec   :  { %v2453_v21 = vmul.f32 -1.442695, %v1913_v10 }
 0x5ed   :  { %v2681_v44 = vpop.eup %2680 }
 0x5ee   :  { %v2683_v30 = vpop.eup %2682  ;;  %v1917_v31 = vadd.f32 1.0, %v2681_v44  ;;  %2684 = vpow2.f32 %v2453_v21 }
 0x5ef   :  { %v1936_v40 = vadd.f32 1.0, %v2683_v30 }
 0x5f0   :  { %2686 = vrcp.f32 %v1917_v31  ;;  %v1929_v35 = vand.u32 2147483648, %v1917_v31  ;;  %v1927_v18 = vand.u32 2147483647, %v1917_v31  ;;  %vm1923_vm6 = vweird.f32 %v1917_v31 }
 0x5f1   :  { %2688 = vrcp.f32 %v1936_v40  ;;  %v1895_v43 = vpop.f32.mrf.mxu2  ;;  %v1908_v51 = vpop.f32.mrf.mxu3  ;;  %v1948_v0 = vand.u32 2147483648, %v1936_v40  ;;  %v1946_v33 = vand.u32 2147483647, %v1936_v40  ;;  %vm1942_vm7 = vweird.f32 %v1936_v40 }
 0x5f2   :  { %v1930_v55 = vor.u32 1.1754944e-38, %v1929_v35  ;;  %vm1928_vm10 = vcmp.eq.f32.partialorder %v1927_v18, 8.507059e+37 }
 0x5f3   :  { %v1949_v12 = vor.u32 1.1754944e-38, %v1948_v0  ;;  %vm1947_vm11 = vcmp.eq.f32.partialorder %v1946_v33, 8.507059e+37 }
 0x5f4   :  { %v2685_v56 = vpop.eup %2684 }
 0x5f5   :  { %v1956_v34 = vadd.f32 1.0, %v2685_v56 }
 0x5f6   :  { %v2687_v2 = vpop.eup %2686 }
 0x5f7   :  { %v2689_v9 = vpop.eup %2688  ;;  %v1919_v15 = vmul.f32 %v2687_v2, %v1917_v31  ;;  %2690 = vrcp.f32 %v1956_v34  ;;  %vm1924_vm4 = vweird.f32 %v2687_v2  ;;  %v1968_v19 = vand.u32 2147483648, %v1956_v34 }
 0x5f8   :  { %v1938_v17 = vmul.f32 %v2689_v9, %v1936_v40  ;;  %2692 = vtanh.f32 %v1912_v5  ;;  %vm1943_vm5 = vweird.f32 %v2689_v9  ;;  %vm1925_vm8 = vmor %vm1923_vm6, %vm1924_vm4  ;;  %vm1962_vm13 = vweird.f32 %v1956_v34 }
 0x5f9   :  { %v1920_v24 = vsub.f32 1.0, %v1919_v15  ;;  %vm1944_vm9 = vmor %vm1942_vm7, %vm1943_vm5  ;;  %v1966_v45 = vand.u32 2147483647, %v1956_v34  ;;  %v1969_v16 = vor.u32 1.1754944e-38, %v1968_v19 }
 0x5fa   :  { %v1939_v36 = vsub.f32 1.0, %v1938_v17 }
 0x5fb   :  { %v1921_v22 = vmul.f32 %v2687_v2, %v1920_v24  ;;  %vm1967_vm15 = vcmp.eq.f32.partialorder %v1966_v45, 8.507059e+37 }
 0x5fc   :  { %v1940_v47 = vmul.f32 %v2689_v9, %v1939_v36 }
 0x5fd   :  { %v2691_v39 = vpop.eup %2690  ;;  %v1922_v13 = vadd.f32 %v2687_v2, %v1921_v22 }
 0x5fe   :  { %v1941_v48 = vadd.f32 %v2689_v9, %v1940_v47  ;;  %v1958_v52 = vmul.f32 %v2691_v39, %v1956_v34  ;;  %v2693_v6 = vpop.eup %2692  ;;  %vm1963_vm12 = vweird.f32 %v2691_v39 }
 0x5ff   :  { %v1926_v60 = vsel %vm1925_vm8, %v2687_v2, %v1922_v13  ;;  %vm1964_vm14 = vmor %vm1962_vm13, %vm1963_vm12 }
 0x600   :  { %v1931_v62 = vsel %vm1928_vm10, %v1930_v55, %v1926_v60  ;;  %v1945_v25 = vsel %vm1944_vm9, %v2689_v9, %v1941_v48  ;;  %v1959_v61 = vsub.f32 1.0, %v1958_v52 }
 0x601   :  { %v1973_v53 = vmul.f32 %v2693_v6, %v1931_v62  ;;  %v1950_v50 = vsel %vm1947_vm11, %v1949_v12, %v1945_v25 }
 0x602   :  { %v1960_v1 = vmul.f32 %v2691_v39, %v1959_v61  ;;  %v1972_v46 = vmul.f32 %v1950_v50, %v3318_v49  ;;  %v1985_v49 = vstv %s3340_s5 }
 0x604   :  { %v1974_v26 = vadd.f32 %v1973_v53, %v1972_v46  ;;  %v1961_v7 = vadd.f32 %v2691_v39, %v1960_v1 }
 0x606   :  { %2694 = vtanh.f32 %v1974_v26  ;;  %v1965_v11 = vsel %vm1964_vm14, %v2691_v39, %v1961_v7 }
 0x607   :  { %v1970_v28 = vsel %vm1967_vm15, %v1969_v16, %v1965_v11 }
 0x60c   :  { %v2695_v27 = vpop.eup %2694 }
 0x60d   :  { %v1976_v29 = vmul.f32 %v2695_v27, %v1970_v28 }
 0x60f   :  { %v1981_v41 = vmul.f32 %v2567_v23, %v1976_v29 }
 0x611   :  { %1982 = vadd.xlane.f32.xlu0 %v1981_v41 }
 0x684   :  { %v1983_v32 = vpop.xlane.xlu0 %1982 }
 0x685   :  { %v1986_v37 = vadd.f32 %v1985_v49, %v1983_v32 }
 0x687   :  { %v2454_v38 = vmul.f32 -1.442695, %v1986_v37 }
 0x689   :  { %2696 = vpow2.f32 %v2454_v38 }
 0x68f   :  { %v2697_v42 = vpop.eup %2696 }
 0x690   :  { %v1990_v54 = vadd.f32 1.0, %v2697_v42 }
 0x692   :  { %2698 = vrcp.f32 %v1990_v54  ;;  %v2002_v3 = vand.u32 2147483648, %v1990_v54  ;;  %v2000_v8 = vand.u32 2147483647, %v1990_v54  ;;  %vm1996_vm1 = vweird.f32 %v1990_v54 }
 0x694   :  { %v2003_v14 = vor.u32 1.1754944e-38, %v2002_v3  ;;  %vm2001_vm4 = vcmp.eq.f32.partialorder %v2000_v8, 8.507059e+37 }
 0x698   :  { %v2699_v58 = vpop.eup %2698 }
 0x699   :  { %v1992_v59 = vmul.f32 %v2699_v58, %v1990_v54  ;;  %vm1997_vm0 = vweird.f32 %v2699_v58 }
 0x69a   :  { %vm1998_vm2 = vmor %vm1996_vm1, %vm1997_vm0 }
 0x69b   :  { %v1993_v63 = vsub.f32 1.0, %v1992_v59 }
 0x69d   :  { %v1994_v4 = vmul.f32 %v2699_v58, %v1993_v63 }
 0x69f   :  { %v1995_v10 = vadd.f32 %v2699_v58, %v1994_v4 }
 0x6a1   :  { %v1999_v20 = vsel %vm1998_vm2, %v2699_v58, %v1995_v10 }
 0x6a2   :  { %v2004_v21 = vsel %vm2001_vm4, %v2003_v14, %v1999_v20 }
 0x6a3   :  { %2007 = vst.msk [vmem:[%s3341_s6] sm:$0xff] %vm2006_vm3, %v2004_v21 }
 0x6a4   :  { %2012 = vsyncpa [#allocation5], 1 }
 0x6a5   :  { %2013 = vsyncpa [#allocation7], 1 }

</bundles_post_ra>
